<compile_context>
chip_gen: v6e
topology: v6e:2x2x1
jax: 0.10.0
libtpu: 0.0.40
codegen_flags: <defaults>
</compile_context>

<pallas_src>
import math
from functools import partial

import jax
import jax.numpy as jnp
from jax import lax
from jax.experimental import pallas as pl
from jax.experimental.pallas import tpu as pltpu


# ----------------------- per-generation VMEM sizing ---------------------------

def _vmem_capacity_bytes():
    try:
        return int(pltpu.get_tpu_info().vmem_capacity_bytes)
    except Exception:
        return 64 * 1024 * 1024          # conservative (v7x-sized) fallback

_VMEM_CAP = _vmem_capacity_bytes()
_BIG_VMEM = _VMEM_CAP >= 100 * 1024 * 1024           # v5e / v6e 128 MiB parts
_VMEM_LIMIT = (96 if _BIG_VMEM else 48) * 1024 * 1024

# Tile targets re-derived per generation (review feedback).
_MM_TM, _MM_TN, _MM_TK = (512, 512, 1024) if _BIG_VMEM else (256, 512, 512)
_FLASH_TILE = 256 if _BIG_VMEM else 128
_SWIGLU_TF = 1024 if _BIG_VMEM else 256
_NORM_TM = 256


def _pick_tile(dim, target, align):
    """Largest multiple of `align` that divides `dim` and is <= target, else dim."""
    if dim <= target:
        return dim
    t = (target // align) * align
    while t >= align:
        if dim % t == 0:
            return t
        t -= align
    return dim  # fall back to the full (untiled) dimension


# --------------------------- tiled matmul (linear) -----------------------------

def _matmul_kernel(x_ref, w_ref, o_ref, acc_ref):
    @pl.when(pl.program_id(2) == 0)
    def _():
        acc_ref[...] = jnp.zeros_like(acc_ref)

    acc_ref[...] += jnp.dot(x_ref[...], w_ref[...],
                            preferred_element_type=jnp.float32)

    @pl.when(pl.program_id(2) == pl.num_programs(2) - 1)
    def _():
        o_ref[...] = acc_ref[...].astype(o_ref.dtype)


def linear(x, w, *, out_dtype=None, tm=None, tn=None, tk=None):
    """y = x @ w, x: (..., K), w: (K, N)."""
    orig_shape = x.shape
    K = orig_shape[-1]
    M = 1
    for d in orig_shape[:-1]:
        M *= d
    x2d = x.reshape(M, K)
    N = w.shape[1]
    out_dtype = out_dtype or x.dtype

    tm = _pick_tile(M, tm or _MM_TM, 16)    # 16-row granules (bf16 sublane packing)
    tn = _pick_tile(N, tn or _MM_TN, 128)
    tk = _pick_tile(K, tk or _MM_TK, 128)

    itemsize = jnp.dtype(x.dtype).itemsize
    out = pl.pallas_call(
        _matmul_kernel,
        out_shape=jax.ShapeDtypeStruct((M, N), out_dtype),
        grid=(M // tm, N // tn, K // tk),
        in_specs=[pl.BlockSpec((tm, tk), lambda i, j, k: (i, k)),
                  pl.BlockSpec((tk, tn), lambda i, j, k: (k, j))],
        out_specs=pl.BlockSpec((tm, tn), lambda i, j, k: (i, j)),
        scratch_shapes=[pltpu.VMEM((tm, tn), jnp.float32)],
        compiler_params=pltpu.CompilerParams(
            dimension_semantics=("parallel", "parallel", "arbitrary"),
            vmem_limit_bytes=_VMEM_LIMIT),
        cost_estimate=pl.CostEstimate(
            flops=2 * M * N * K,
            transcendentals=0,
            bytes_accessed=(M * K + K * N + M * N) * itemsize),
    )(x2d, w)
    return out.reshape(orig_shape[:-1] + (N,))


# --------------------------------- RMSNorm -------------------------------------

def _rmsnorm_kernel(x_ref, w_ref, o_ref):
    x = x_ref[...].astype(jnp.float32)
    ms = jnp.mean(x * x, axis=-1, keepdims=True)
    inv = lax.rsqrt(ms + 1e-5)
    o_ref[...] = (x * inv * w_ref[...].astype(jnp.float32)).astype(o_ref.dtype)


def rmsnorm(x2d, w, *, tm=None):
    M, D = x2d.shape
    tm = _pick_tile(M, tm or _NORM_TM, 16)
    w2 = w.reshape(1, D)
    return pl.pallas_call(
        _rmsnorm_kernel,
        out_shape=jax.ShapeDtypeStruct((M, D), x2d.dtype),
        grid=(M // tm,),
        in_specs=[pl.BlockSpec((tm, D), lambda i: (i, 0)),
                  pl.BlockSpec((1, D), lambda i: (0, 0))],
        out_specs=pl.BlockSpec((tm, D), lambda i: (i, 0)),
        compiler_params=pltpu.CompilerParams(
            dimension_semantics=("parallel",),
            vmem_limit_bytes=_VMEM_LIMIT),
    )(x2d, w2)


def _add_rmsnorm_kernel(x_ref, r_ref, w_ref, x2_ref, h_ref):
    # Fused residual add + RMSNorm: x2 = x + r ; h = rmsnorm(x2)
    x2 = x_ref[...].astype(jnp.float32) + r_ref[...].astype(jnp.float32)
    x2_ref[...] = x2.astype(x2_ref.dtype)
    ms = jnp.mean(x2 * x2, axis=-1, keepdims=True)
    inv = lax.rsqrt(ms + 1e-5)
    h_ref[...] = (x2 * inv * w_ref[...].astype(jnp.float32)).astype(h_ref.dtype)


def add_rmsnorm(x2d, r2d, w, *, tm=None):
    M, D = x2d.shape
    tm = _pick_tile(M, tm or _NORM_TM, 16)
    w2 = w.reshape(1, D)
    return pl.pallas_call(
        _add_rmsnorm_kernel,
        out_shape=(jax.ShapeDtypeStruct((M, D), x2d.dtype),
                   jax.ShapeDtypeStruct((M, D), x2d.dtype)),
        grid=(M // tm,),
        in_specs=[pl.BlockSpec((tm, D), lambda i: (i, 0)),
                  pl.BlockSpec((tm, D), lambda i: (i, 0)),
                  pl.BlockSpec((1, D), lambda i: (0, 0))],
        out_specs=(pl.BlockSpec((tm, D), lambda i: (i, 0)),
                   pl.BlockSpec((tm, D), lambda i: (i, 0))),
        compiler_params=pltpu.CompilerParams(
            dimension_semantics=("parallel",),
            vmem_limit_bytes=_VMEM_LIMIT),
    )(x2d, r2d, w2)


# ------------------ flash causal attention (fused RoPE, lane-dense out) ---------

def _flash_kernel(q_ref, k_ref, v_ref, cq_ref, sq_ref, ck_ref, sk_ref,
                  o_ref, m_sc, l_sc, acc_sc, qrot_sc):
    qi = pl.program_id(1)
    ki = pl.program_id(2)
    H, _, dh = acc_sc.shape
    half = dh // 2

    def rope(x, cos, sin):
        # Rotate-half RoPE (f32): x (H, t, dh); cos/sin (t, dh).
        # TODO(synk): at production dh use pltpu.roll(x, dh//2, axis=-1) with a
        # sign-folded sin table (XLU slot is idle); concat form kept for robustness.
        xr = jnp.concatenate([-x[..., half:], x[..., :half]], axis=-1)
        return x * cos[None] + xr * sin[None]

    @pl.when(ki == 0)
    def _():
        m_sc[...] = jnp.full_like(m_sc, -jnp.inf)
        l_sc[...] = jnp.zeros_like(l_sc)
        acc_sc[...] = jnp.zeros_like(acc_sc)
        # Rotate (and, via the scaled cos/sin tables, 1/sqrt(dh)-scale) q once per
        # q tile and cache it; the q block stays resident across the kv loop.
        qf = q_ref[0].astype(jnp.float32)
        qrot_sc[...] = rope(qf, cq_ref[...], sq_ref[...]).astype(qrot_sc.dtype)

    def attend(masked):
        kf = k_ref[0].astype(jnp.float32)
        k_rot = rope(kf, ck_ref[...], sk_ref[...]).astype(k_ref.dtype)
        v = v_ref[0]
        q = qrot_sc[...]
        s = jnp.einsum("hqd,hkd->hqk", q, k_rot,
                       preferred_element_type=jnp.float32)     # (H, tq, tkv)
        if masked:  # only the diagonal tile pays for the iota/compare/select mask
            row = lax.broadcasted_iota(jnp.int32, s.shape, 1)
            col = lax.broadcasted_iota(jnp.int32, s.shape, 2)
            s = jnp.where(col <= row, s, -jnp.inf)
        m_new = jnp.maximum(m_sc[...], s.max(axis=-1, keepdims=True))
        alpha = jnp.exp(m_sc[...] - m_new)
        p = jnp.exp(s - m_new)
        l_sc[...] = alpha * l_sc[...] + p.sum(axis=-1, keepdims=True)
        acc_sc[...] = alpha * acc_sc[...] + jnp.einsum(
            "hqk,hkd->hqd", p.astype(v.dtype), v,
            preferred_element_type=jnp.float32)
        m_sc[...] = m_new

    @pl.when(ki < qi)
    def _():
        attend(masked=False)

    @pl.when(ki == qi)
    def _():
        attend(masked=True)
        # Last live KV tile for this q tile: normalize, merge heads, and write a
        # lane-dense (t, H*dh) block (no dh-wide masked stores, no XLA transpose).
        inv = pl.reciprocal(l_sc[...], approx=True)             # (H, t, 1)
        merged = jnp.concatenate(
            [acc_sc[h] * inv[h] for h in range(H)], axis=-1)    # (t, H*dh)
        o_ref[0] = merged.astype(o_ref.dtype)


def flash_attention(q, k, v, cos, sin, *, tile=None):
    """Causal MHA with fused RoPE. q,k,v: (B,H,S,dh); cos,sin: (S,dh) rotate-half
    tables. Returns (B, S, H*dh) with heads merged in-kernel (lane-dense)."""
    B, H, S, dh = q.shape
    D = H * dh
    t = _pick_tile(S, tile or _FLASH_TILE, 16)
    # tq == tkv keeps the diagonal tile NaN-free (every row has >= 1 unmasked col).
    assert S % t == 0

    scale = 1.0 / math.sqrt(dh)
    cos_q = (cos * scale).astype(jnp.float32)   # fold 1/sqrt(dh) into q's RoPE
    sin_q = (sin * scale).astype(jnp.float32)
    cos_k = cos.astype(jnp.float32)
    sin_k = sin.astype(jnp.float32)

    qspec = pl.BlockSpec((1, H, t, dh), lambda b, qi, ki: (b, 0, qi, 0))
    # Clamp K/V (and their RoPE tables) to the diagonal: for ki > qi the block
    # index repeats, so Pallas elides the DMA of upper-triangle tiles entirely.
    kspec = pl.BlockSpec((1, H, t, dh),
                         lambda b, qi, ki: (b, 0, jnp.minimum(ki, qi), 0))
    cqspec = pl.BlockSpec((t, dh), lambda b, qi, ki: (qi, 0))
    ckspec = pl.BlockSpec((t, dh), lambda b, qi, ki: (jnp.minimum(ki, qi), 0))
    ospec = pl.BlockSpec((1, t, D), lambda b, qi, ki: (b, qi, 0))

    itemsize = jnp.dtype(q.dtype).itemsize
    return pl.pallas_call(
        _flash_kernel,
        out_shape=jax.ShapeDtypeStruct((B, S, D), q.dtype),
        grid=(B, S // t, S // t),
        in_specs=[qspec, kspec, kspec, cqspec, cqspec, ckspec, ckspec],
        out_specs=ospec,
        scratch_shapes=[pltpu.VMEM((H, t, 1), jnp.float32),   # m
                        pltpu.VMEM((H, t, 1), jnp.float32),   # l
                        pltpu.VMEM((H, t, dh), jnp.float32),  # acc
                        pltpu.VMEM((H, t, dh), q.dtype)],     # cached rotated q
        compiler_params=pltpu.CompilerParams(
            dimension_semantics=("parallel", "parallel", "arbitrary"),
            vmem_limit_bytes=_VMEM_LIMIT),
        cost_estimate=pl.CostEstimate(
            flops=2 * B * H * S * S * dh,
            transcendentals=B * H * S * S // 2,
            bytes_accessed=(3 * B * H * S * dh + B * S * D) * itemsize),
    )(q, k, v, cos_q, sin_q, cos_k, sin_k)


# -------------------------------- SwiGLU FFN -----------------------------------

def _swiglu_kernel(x_ref, w1_ref, w3_ref, w2_ref, o_ref, acc_ref):
    @pl.when(pl.program_id(1) == 0)
    def _():
        acc_ref[...] = jnp.zeros_like(acc_ref)

    x = x_ref[...]
    h1 = jnp.dot(x, w1_ref[...], preferred_element_type=jnp.float32)
    h3 = jnp.dot(x, w3_ref[...], preferred_element_type=jnp.float32)
    sig = pl.reciprocal(1.0 + jnp.exp(-h1), approx=True)      # EUP sigmoid
    g = (h1 * sig) * h3                                        # SiLU(h1) * h3
    acc_ref[...] += jnp.dot(g.astype(w2_ref.dtype), w2_ref[...],
                            preferred_element_type=jnp.float32)

    @pl.when(pl.program_id(1) == pl.num_programs(1) - 1)
    def _():
        o_ref[...] = acc_ref[...].astype(o_ref.dtype)


def swiglu(x2d, w1, w3, w2, *, tm=256, tf=None):
    M, D = x2d.shape
    F = w1.shape[1]
    tm = _pick_tile(M, tm, 16)

    # Cap tf so the double-buffered w1/w3/w2 tiles stay within ~half the VMEM limit
    # (v7x headroom); grow toward 1024 on 128 MiB parts to cut weight re-streams.
    wbytes = jnp.dtype(w1.dtype).itemsize
    per_col_bytes = 3 * D * wbytes * 2
    max_tf = max(128, ((int(0.5 * _VMEM_LIMIT) // per_col_bytes) // 128) * 128)
    tf = _pick_tile(F, min(tf or _SWIGLU_TF, max_tf), 128)

    itemsize = jnp.dtype(x2d.dtype).itemsize
    return pl.pallas_call(
        _swiglu_kernel,
        out_shape=jax.ShapeDtypeStruct((M, D), x2d.dtype),
        grid=(M // tm, F // tf),
        in_specs=[pl.BlockSpec((tm, D), lambda i, f: (i, 0)),
                  pl.BlockSpec((D, tf), lambda i, f: (0, f)),
                  pl.BlockSpec((D, tf), lambda i, f: (0, f)),
                  pl.BlockSpec((tf, D), lambda i, f: (f, 0))],
        out_specs=pl.BlockSpec((tm, D), lambda i, f: (i, 0)),
        scratch_shapes=[pltpu.VMEM((tm, D), jnp.float32)],
        compiler_params=pltpu.CompilerParams(
            dimension_semantics=("parallel", "arbitrary"),
            vmem_limit_bytes=_VMEM_LIMIT),
        cost_estimate=pl.CostEstimate(
            flops=6 * M * D * F,
            transcendentals=M * F,
            bytes_accessed=(2 * M * D + 3 * D * F) * itemsize),
    )(x2d, w1, w3, w2)


# --------------------------------- JAX glue ------------------------------------

def attention_block(h2d, p, B, S, num_heads, cos, sin):
    D = h2d.shape[-1]
    dh = D // num_heads
    qkv = linear(h2d, p["wqkv"])                              # (B*S, 3D) fused QKV
    qkv = qkv.reshape(B, S, 3, num_heads, dh).transpose(2, 0, 3, 1, 4)
    # TODO(synk): read q/k/v straight out of the fused (B,S,3,H,dh) buffer via
    # BlockSpec index maps to drop this remaining XLA transpose (one HBM round
    # trip of activations per layer).
    q, k, v = qkv[0], qkv[1], qkv[2]
    o = flash_attention(q, k, v, cos, sin)                    # (B, S, D) lane-dense
    return linear(o.reshape(B * S, D), p["wo"])               # (B*S, D)


def transformer_forward(params, inds, num_heads, theta):
    x = jnp.take(params["emb"], inds, axis=0)   # embedding gather (glue)
    B, S, D = x.shape
    dh = D // num_heads
    half = dh // 2

    # Rotate-half RoPE tables (S, dh).  With randomly initialized weights this is
    # the same model family as interleaved RoPE; for pretrained interleaved
    # checkpoints permute wq/wk columns once at load time.
    pos = jnp.arange(S, dtype=jnp.float32)
    inv_freq = theta ** (-(jnp.arange(half, dtype=jnp.float32) * 2.0 / dh))
    ang = pos[:, None] * inv_freq[None, :]                    # (S, dh/2)
    cos = jnp.concatenate([jnp.cos(ang), jnp.cos(ang)], axis=-1)
    sin = jnp.concatenate([jnp.sin(ang), jnp.sin(ang)], axis=-1)

    layers = params["layers"]
    x2d = x.reshape(B * S, D)
    h = rmsnorm(x2d, layers[0]["norm1"])        # first pre-norm (no residual yet)
    for li, p in enumerate(layers):
        attn = attention_block(h, p, B, S, num_heads, cos, sin)
        x2d, h = add_rmsnorm(x2d, attn, p["norm2"])            # x2 = x+attn; h = norm2
        ffn = swiglu(h, p["w1"], p["w3"], p["w2"])
        nxt = layers[li + 1]["norm1"] if li + 1 < len(layers) else params["norm_final"]
        x2d, h = add_rmsnorm(x2d, ffn, nxt)                    # x3 = x2+ffn; h = next norm
    logits = linear(h, params["dense_final"], out_dtype=jnp.float32)
    return logits.reshape(B, S, -1)


# ------------------------------ parameter init ----------------------------------

def init_params(key, vocab_size, d_model, d_ff, num_heads, num_layers,
                dtype=jnp.bfloat16):
    def nrm(k, shape, std=0.02):
        return (std * jax.random.normal(k, shape)).astype(dtype)

    keys = jax.random.split(key, num_layers + 2)
    params = {
        "emb": nrm(keys[0], (vocab_size, d_model)),
        "norm_final": jnp.ones((d_model,), jnp.float32),
        "dense_final": nrm(keys[1], (d_model, vocab_size)),
        "layers": [],
    }
    for li in range(num_layers):
        lk = jax.random.split(keys[2 + li], 7)
        wq = nrm(lk[0], (d_model, d_model))
        wk = nrm(lk[1], (d_model, d_model))
        wv = nrm(lk[2], (d_model, d_model))
        params["layers"].append({
            "norm1": jnp.ones((d_model,), jnp.float32),
            "norm2": jnp.ones((d_model,), jnp.float32),
            "wqkv": jnp.concatenate([wq, wk, wv], axis=1),   # fused (D, 3D)
            "wo": nrm(lk[3], (d_model, d_model)),
            "w1": nrm(lk[4], (d_model, d_ff)),
            "w3": nrm(lk[5], (d_model, d_ff)),
            "w2": nrm(lk[6], (d_ff, d_model)),
        })
    return params


# ------------------------------------ main ---------------------------------------

if __name__ == "__main__":
    vocab_size = 32
    context_length = 16
    d_model = 32
    d_ff = 64
    num_heads = 4
    num_layers = 2
    theta = 10000.0

    batch, seq = 2, 8

    key = jax.random.PRNGKey(0)
    pkey, ikey = jax.random.split(key)
    params = init_params(pkey, vocab_size, d_model, d_ff, num_heads, num_layers)
    inds = jax.random.randint(ikey, (batch, seq), 0, vocab_size, dtype=jnp.int32)

    fwd = jax.jit(partial(transformer_forward, num_heads=num_heads, theta=theta))
    logits = fwd(params, inds)
    logits = jax.block_until_ready(logits)

    assert logits.shape == (batch, seq, vocab_size)
    assert logits.dtype == jnp.float32
    assert bool(jnp.all(jnp.isfinite(logits)))
    print("KERNEL_OK")
</pallas_src>

<mosaic_0001>
module attributes {stable_mosaic.version = 11 : i64} {
  func.func @_rmsnorm_kernel(%arg0: i32, %arg1: memref<16x32xbf16, #tpu.memory_space<vmem>>, %arg2: memref<1x32xf32, #tpu.memory_space<vmem>>, %arg3: memref<16x32xbf16, #tpu.memory_space<vmem>>) attributes {dimension_semantics = [#tpu.dimension_semantics<parallel>], iteration_bounds = array<i64: 1>, scalar_prefetch = 0 : i64, scratch_operands = 0 : i64, tpu.core_type = #tpu.core_type<tc>, window_params = [{transform_indices = @transform_0, window_bounds = array<i64: 16, 32>}, {pipeline_mode = #tpu.pipeline_mode<synchronous>, transform_indices = @transform_1, window_bounds = array<i64: 1, 32>}, {transform_indices = @transform_2, window_bounds = array<i64: 16, 32>}]} {
    %c0 = arith.constant 0 : index
    %c0_0 = arith.constant 0 : index
    %0 = vector.load %arg1[%c0, %c0_0] : memref<16x32xbf16, #tpu.memory_space<vmem>>, vector<16x32xbf16>
    %1 = arith.extf %0 : vector<16x32xbf16> to vector<16x32xf32>
    %2 = arith.mulf %1, %1 : vector<16x32xf32>
    %cst = arith.constant dense<0.000000e+00> : vector<16xf32>
    %3 = vector.multi_reduction <add>, %2, %cst [1] : vector<16x32xf32> to vector<16xf32>
    %4 = vector.shape_cast %3 : vector<16xf32> to vector<16x1xf32>
    %cst_1 = arith.constant 3.200000e+01 : f32
    %5 = vector.broadcast %cst_1 : f32 to vector<16x1xf32>
    %6 = arith.divf %4, %5 : vector<16x1xf32>
    %cst_2 = arith.constant 9.99999974E-6 : f32
    %7 = vector.broadcast %cst_2 : f32 to vector<16x1xf32>
    %8 = arith.addf %6, %7 : vector<16x1xf32>
    %9 = math.rsqrt %8 : vector<16x1xf32>
    %10 = vector.broadcast %9 : vector<16x1xf32> to vector<16x32xf32>
    %11 = arith.mulf %1, %10 : vector<16x32xf32>
    %c0_3 = arith.constant 0 : index
    %c0_4 = arith.constant 0 : index
    %12 = vector.load %arg2[%c0_3, %c0_4] : memref<1x32xf32, #tpu.memory_space<vmem>>, vector<1x32xf32>
    %13 = vector.broadcast %12 : vector<1x32xf32> to vector<16x32xf32>
    %14 = arith.mulf %11, %13 : vector<16x32xf32>
    %15 = arith.truncf %14 : vector<16x32xf32> to vector<16x32xbf16>
    %c0_5 = arith.constant 0 : index
    %c0_6 = arith.constant 0 : index
    %16 = vector.load %arg3[%c0_5, %c0_6] : memref<16x32xbf16, #tpu.memory_space<vmem>>, vector<16x32xbf16>
    tpu.vector_store %arg3[%c0_5, %c0_6], %15 {strides = array<i32>} : memref<16x32xbf16, #tpu.memory_space<vmem>>, vector<16x32xbf16>,
    return
  }
  func.func @transform_0(%arg0: i32) -> (i32, i32) {
    %c0_i32 = arith.constant 0 : i32
    %c0_i32_0 = arith.constant 0 : i32
    return %arg0, %c0_i32 : i32, i32
  }
  func.func @transform_1(%arg0: i32) -> (i32, i32) {
    %c0_i32 = arith.constant 0 : i32
    %c0_i32_0 = arith.constant 0 : i32
    %c0_i32_1 = arith.constant 0 : i32
    return %c0_i32, %c0_i32_0 : i32, i32
  }
  func.func @transform_2(%arg0: i32) -> (i32, i32) {
    %c0_i32 = arith.constant 0 : i32
    %c0_i32_0 = arith.constant 0 : i32
    return %arg0, %c0_i32 : i32, i32
  }
}

module attributes {stable_mosaic.version = 11 : i64} {
  func.func @_matmul_kernel(%arg0: i32, %arg1: i32, %arg2: i32, %arg3: memref<16x32xbf16, #tpu.memory_space<vmem>>, %arg4: memref<32x96xbf16, #tpu.memory_space<vmem>>, %arg5: memref<16x96xbf16, #tpu.memory_space<vmem>>, %arg6: memref<16x96xf32, #tpu.memory_space<vmem>>) attributes {dimension_semantics = [#tpu.dimension_semantics<parallel>, #tpu.dimension_semantics<parallel>, #tpu.dimension_semantics<arbitrary>], iteration_bounds = array<i64: 1, 1, 1>, scalar_prefetch = 0 : i64, scratch_operands = 1 : i64, tpu.core_type = #tpu.core_type<tc>, window_params = [{transform_indices = @transform_0, window_bounds = array<i64: 16, 32>}, {transform_indices = @transform_1, window_bounds = array<i64: 32, 96>}, {transform_indices = @transform_2, window_bounds = array<i64: 16, 96>}]} {
    %c0_i32 = arith.constant 0 : i32
    %0 = arith.cmpi eq, %arg2, %c0_i32 : i32
    %1 = arith.extui %0 : i1 to i32
    %c0_i32_0 = arith.constant 0 : i32
    %2 = arith.cmpi ne, %1, %c0_i32_0 : i32
    scf.if %2 {
      %cst_10 = arith.constant 0.000000e+00 : f32
      %12 = vector.broadcast %cst_10 : f32 to vector<16x96xf32>
      %c0_11 = arith.constant 0 : index
      %c0_12 = arith.constant 0 : index
      %13 = vector.load %arg6[%c0_11, %c0_12] : memref<16x96xf32, #tpu.memory_space<vmem>>, vector<16x96xf32>
      tpu.vector_store %arg6[%c0_11, %c0_12], %12 {strides = array<i32>} : memref<16x96xf32, #tpu.memory_space<vmem>>, vector<16x96xf32>,
    } else {
    }
    %c0 = arith.constant 0 : index
    %c0_1 = arith.constant 0 : index
    %3 = vector.load %arg6[%c0, %c0_1] : memref<16x96xf32, #tpu.memory_space<vmem>>, vector<16x96xf32>
    %c0_2 = arith.constant 0 : index
    %c0_3 = arith.constant 0 : index
    %4 = vector.load %arg3[%c0_2, %c0_3] : memref<16x32xbf16, #tpu.memory_space<vmem>>, vector<16x32xbf16>
    %c0_4 = arith.constant 0 : index
    %c0_5 = arith.constant 0 : index
    %5 = vector.load %arg4[%c0_4, %c0_5] : memref<32x96xbf16, #tpu.memory_space<vmem>>, vector<32x96xbf16>
    %cst = arith.constant dense<0.000000e+00> : vector<16x96xf32>
    %6 = tpu.matmul %4, %5, %cst {dimension_numbers = #tpu.dot_dimension_numbers<[1], [0], [0], [1], [0, 0, 1, 1], [], []>} : vector<16x32xbf16>, vector<32x96xbf16>, vector<16x96xf32> -> vector<16x96xf32>
    %7 = arith.addf %3, %6 : vector<16x96xf32>
    %c0_6 = arith.constant 0 : index
    %c0_7 = arith.constant 0 : index
    %8 = vector.load %arg6[%c0_6, %c0_7] : memref<16x96xf32, #tpu.memory_space<vmem>>, vector<16x96xf32>
    tpu.vector_store %arg6[%c0_6, %c0_7], %7 {strides = array<i32>} : memref<16x96xf32, #tpu.memory_space<vmem>>, vector<16x96xf32>,
    %c0_i32_8 = arith.constant 0 : i32
    %9 = arith.cmpi eq, %arg2, %c0_i32_8 : i32
    %10 = arith.extui %9 : i1 to i32
    %c0_i32_9 = arith.constant 0 : i32
    %11 = arith.cmpi ne, %10, %c0_i32_9 : i32
    scf.if %11 {
      %c0_10 = arith.constant 0 : index
      %c0_11 = arith.constant 0 : index
      %12 = vector.load %arg6[%c0_10, %c0_11] : memref<16x96xf32, #tpu.memory_space<vmem>>, vector<16x96xf32>
      %13 = arith.truncf %12 : vector<16x96xf32> to vector<16x96xbf16>
      %c0_12 = arith.constant 0 : index
      %c0_13 = arith.constant 0 : index
      %14 = vector.load %arg5[%c0_12, %c0_13] : memref<16x96xbf16, #tpu.memory_space<vmem>>, vector<16x96xbf16>
      tpu.vector_store %arg5[%c0_12, %c0_13], %13 {strides = array<i32>} : memref<16x96xbf16, #tpu.memory_space<vmem>>, vector<16x96xbf16>,
    } else {
    }
    return
  }
  func.func @transform_0(%arg0: i32, %arg1: i32, %arg2: i32) -> (i32, i32) {
    %c0_i32 = arith.constant 0 : i32
    return %arg0, %arg2 : i32, i32
  }
  func.func @transform_1(%arg0: i32, %arg1: i32, %arg2: i32) -> (i32, i32) {
    %c0_i32 = arith.constant 0 : i32
    return %arg2, %arg1 : i32, i32
  }
  func.func @transform_2(%arg0: i32, %arg1: i32, %arg2: i32) -> (i32, i32) {
    %c0_i32 = arith.constant 0 : i32
    return %arg0, %arg1 : i32, i32
  }
}

module attributes {stable_mosaic.version = 11 : i64} {
  func.func @_matmul_kernel(%arg0: i32, %arg1: i32, %arg2: i32, %arg3: memref<16x32xbf16, #tpu.memory_space<vmem>>, %arg4: memref<32x32xbf16, #tpu.memory_space<vmem>>, %arg5: memref<16x32xbf16, #tpu.memory_space<vmem>>, %arg6: memref<16x32xf32, #tpu.memory_space<vmem>>) attributes {dimension_semantics = [#tpu.dimension_semantics<parallel>, #tpu.dimension_semantics<parallel>, #tpu.dimension_semantics<arbitrary>], iteration_bounds = array<i64: 1, 1, 1>, scalar_prefetch = 0 : i64, scratch_operands = 1 : i64, tpu.core_type = #tpu.core_type<tc>, window_params = [{transform_indices = @transform_0, window_bounds = array<i64: 16, 32>}, {transform_indices = @transform_1, window_bounds = array<i64: 32, 32>}, {transform_indices = @transform_2, window_bounds = array<i64: 16, 32>}]} {
    %c0_i32 = arith.constant 0 : i32
    %0 = arith.cmpi eq, %arg2, %c0_i32 : i32
    %1 = arith.extui %0 : i1 to i32
    %c0_i32_0 = arith.constant 0 : i32
    %2 = arith.cmpi ne, %1, %c0_i32_0 : i32
    scf.if %2 {
      %cst_10 = arith.constant 0.000000e+00 : f32
      %12 = vector.broadcast %cst_10 : f32 to vector<16x32xf32>
      %c0_11 = arith.constant 0 : index
      %c0_12 = arith.constant 0 : index
      %13 = vector.load %arg6[%c0_11, %c0_12] : memref<16x32xf32, #tpu.memory_space<vmem>>, vector<16x32xf32>
      tpu.vector_store %arg6[%c0_11, %c0_12], %12 {strides = array<i32>} : memref<16x32xf32, #tpu.memory_space<vmem>>, vector<16x32xf32>,
    } else {
    }
    %c0 = arith.constant 0 : index
    %c0_1 = arith.constant 0 : index
    %3 = vector.load %arg6[%c0, %c0_1] : memref<16x32xf32, #tpu.memory_space<vmem>>, vector<16x32xf32>
    %c0_2 = arith.constant 0 : index
    %c0_3 = arith.constant 0 : index
    %4 = vector.load %arg3[%c0_2, %c0_3] : memref<16x32xbf16, #tpu.memory_space<vmem>>, vector<16x32xbf16>
    %c0_4 = arith.constant 0 : index
    %c0_5 = arith.constant 0 : index
    %5 = vector.load %arg4[%c0_4, %c0_5] : memref<32x32xbf16, #tpu.memory_space<vmem>>, vector<32x32xbf16>
    %cst = arith.constant dense<0.000000e+00> : vector<16x32xf32>
    %6 = tpu.matmul %4, %5, %cst {dimension_numbers = #tpu.dot_dimension_numbers<[1], [0], [0], [1], [0, 0, 1, 1], [], []>} : vector<16x32xbf16>, vector<32x32xbf16>, vector<16x32xf32> -> vector<16x32xf32>
    %7 = arith.addf %3, %6 : vector<16x32xf32>
    %c0_6 = arith.constant 0 : index
    %c0_7 = arith.constant 0 : index
    %8 = vector.load %arg6[%c0_6, %c0_7] : memref<16x32xf32, #tpu.memory_space<vmem>>, vector<16x32xf32>
    tpu.vector_store %arg6[%c0_6, %c0_7], %7 {strides = array<i32>} : memref<16x32xf32, #tpu.memory_space<vmem>>, vector<16x32xf32>,
    %c0_i32_8 = arith.constant 0 : i32
    %9 = arith.cmpi eq, %arg2, %c0_i32_8 : i32
    %10 = arith.extui %9 : i1 to i32
    %c0_i32_9 = arith.constant 0 : i32
    %11 = arith.cmpi ne, %10, %c0_i32_9 : i32
    scf.if %11 {
      %c0_10 = arith.constant 0 : index
      %c0_11 = arith.constant 0 : index
      %12 = vector.load %arg6[%c0_10, %c0_11] : memref<16x32xf32, #tpu.memory_space<vmem>>, vector<16x32xf32>
      %13 = arith.truncf %12 : vector<16x32xf32> to vector<16x32xbf16>
      %c0_12 = arith.constant 0 : index
      %c0_13 = arith.constant 0 : index
      %14 = vector.load %arg5[%c0_12, %c0_13] : memref<16x32xbf16, #tpu.memory_space<vmem>>, vector<16x32xbf16>
      tpu.vector_store %arg5[%c0_12, %c0_13], %13 {strides = array<i32>} : memref<16x32xbf16, #tpu.memory_space<vmem>>, vector<16x32xbf16>,
    } else {
    }
    return
  }
  func.func @transform_0(%arg0: i32, %arg1: i32, %arg2: i32) -> (i32, i32) {
    %c0_i32 = arith.constant 0 : i32
    return %arg0, %arg2 : i32, i32
  }
  func.func @transform_1(%arg0: i32, %arg1: i32, %arg2: i32) -> (i32, i32) {
    %c0_i32 = arith.constant 0 : i32
    return %arg2, %arg1 : i32, i32
  }
  func.func @transform_2(%arg0: i32, %arg1: i32, %arg2: i32) -> (i32, i32) {
    %c0_i32 = arith.constant 0 : i32
    return %arg0, %arg1 : i32, i32
  }
}

module attributes {stable_mosaic.version = 11 : i64} {
  func.func @_flash_kernel(%arg0: i32, %arg1: i32, %arg2: i32, %arg3: memref<1x4x8x8xbf16, #tpu.memory_space<vmem>>, %arg4: memref<1x4x8x8xbf16, #tpu.memory_space<vmem>>, %arg5: memref<1x4x8x8xbf16, #tpu.memory_space<vmem>>, %arg6: memref<8x8xf32, #tpu.memory_space<vmem>>, %arg7: memref<8x8xf32, #tpu.memory_space<vmem>>, %arg8: memref<8x8xf32, #tpu.memory_space<vmem>>, %arg9: memref<8x8xf32, #tpu.memory_space<vmem>>, %arg10: memref<1x8x32xbf16, #tpu.memory_space<vmem>>, %arg11: memref<4x8x1xf32, #tpu.memory_space<vmem>>, %arg12: memref<4x8x1xf32, #tpu.memory_space<vmem>>, %arg13: memref<4x8x8xf32, #tpu.memory_space<vmem>>, %arg14: memref<4x8x8xbf16, #tpu.memory_space<vmem>>) attributes {dimension_semantics = [#tpu.dimension_semantics<parallel>, #tpu.dimension_semantics<parallel>, #tpu.dimension_semantics<arbitrary>], iteration_bounds = array<i64: 2, 1, 1>, scalar_prefetch = 0 : i64, scratch_operands = 4 : i64, tpu.core_type = #tpu.core_type<tc>, window_params = [{transform_indices = @transform_0, window_bounds = array<i64: 1, 4, 8, 8>}, {transform_indices = @transform_1, window_bounds = array<i64: 1, 4, 8, 8>}, {transform_indices = @transform_2, window_bounds = array<i64: 1, 4, 8, 8>}, {transform_indices = @transform_3, window_bounds = array<i64: 8, 8>}, {transform_indices = @transform_4, window_bounds = array<i64: 8, 8>}, {transform_indices = @transform_5, window_bounds = array<i64: 8, 8>}, {transform_indices = @transform_6, window_bounds = array<i64: 8, 8>}, {transform_indices = @transform_7, window_bounds = array<i64: 1, 8, 32>}]} {
    %c0_i32 = arith.constant 0 : i32
    %0 = arith.cmpi eq, %arg2, %c0_i32 : i32
    %1 = arith.extui %0 : i1 to i32
    %c0_i32_0 = arith.constant 0 : i32
    %2 = arith.cmpi ne, %1, %c0_i32_0 : i32
    scf.if %2 {
      %cst = arith.constant 0xFF800000 : f32
      %9 = vector.broadcast %cst : f32 to vector<4x8x1xf32>
      %c0 = arith.constant 0 : index
      %c0_3 = arith.constant 0 : index
      %c0_4 = arith.constant 0 : index
      %10 = vector.load %arg11[%c0, %c0_3, %c0_4] : memref<4x8x1xf32, #tpu.memory_space<vmem>>, vector<4x8x1xf32>
      tpu.vector_store %arg11[%c0, %c0_3, %c0_4], %9 {strides = array<i32>} : memref<4x8x1xf32, #tpu.memory_space<vmem>>, vector<4x8x1xf32>,
      %cst_5 = arith.constant 0.000000e+00 : f32
      %11 = vector.broadcast %cst_5 : f32 to vector<4x8x1xf32>
      %c0_6 = arith.constant 0 : index
      %c0_7 = arith.constant 0 : index
      %c0_8 = arith.constant 0 : index
      %12 = vector.load %arg12[%c0_6, %c0_7, %c0_8] : memref<4x8x1xf32, #tpu.memory_space<vmem>>, vector<4x8x1xf32>
      tpu.vector_store %arg12[%c0_6, %c0_7, %c0_8], %11 {strides = array<i32>} : memref<4x8x1xf32, #tpu.memory_space<vmem>>, vector<4x8x1xf32>,
      %cst_9 = arith.constant 0.000000e+00 : f32
      %13 = vector.broadcast %cst_9 : f32 to vector<4x8x8xf32>
      %c0_10 = arith.constant 0 : index
      %c0_11 = arith.constant 0 : index
      %c0_12 = arith.constant 0 : index
      %14 = vector.load %arg13[%c0_10, %c0_11, %c0_12] : memref<4x8x8xf32, #tpu.memory_space<vmem>>, vector<4x8x8xf32>
      tpu.vector_store %arg13[%c0_10, %c0_11, %c0_12], %13 {strides = array<i32>} : memref<4x8x8xf32, #tpu.memory_space<vmem>>, vector<4x8x8xf32>,
      %c0_13 = arith.constant 0 : index
      %c0_14 = arith.constant 0 : index
      %c0_15 = arith.constant 0 : index
      %c0_16 = arith.constant 0 : index
      %15 = vector.load %arg3[%c0_13, %c0_14, %c0_15, %c0_16] : memref<1x4x8x8xbf16, #tpu.memory_space<vmem>>, vector<1x4x8x8xbf16>
      %16 = vector.shape_cast %15 : vector<1x4x8x8xbf16> to vector<4x8x8xbf16>
      %17 = arith.extf %16 : vector<4x8x8xbf16> to vector<4x8x8xf32>
      %c0_17 = arith.constant 0 : index
      %c0_18 = arith.constant 0 : index
      %18 = vector.load %arg6[%c0_17, %c0_18] : memref<8x8xf32, #tpu.memory_space<vmem>>, vector<8x8xf32>
      %c0_19 = arith.constant 0 : index
      %c0_20 = arith.constant 0 : index
      %19 = vector.load %arg7[%c0_19, %c0_20] : memref<8x8xf32, #tpu.memory_space<vmem>>, vector<8x8xf32>
      %20 = vector.extract_strided_slice %17 {offsets = [0, 0, 4], sizes = [4, 8, 4], strides = [1, 1, 1]} : vector<4x8x8xf32> to vector<4x8x4xf32>
      %cst_21 = arith.constant 0.000000e+00 : f32
      %21 = vector.broadcast %cst_21 : f32 to vector<4x8x4xf32>
      %22 = arith.subf %21, %20 : vector<4x8x4xf32>
      %23 = vector.extract_strided_slice %17 {offsets = [0, 0, 0], sizes = [4, 8, 4], strides = [1, 1, 1]} : vector<4x8x8xf32> to vector<4x8x4xf32>
      %24 = tpu.concatenate %22, %23 in 2 : vector<4x8x4xf32>, vector<4x8x4xf32> -> vector<4x8x8xf32>
      %25 = vector.shape_cast %18 : vector<8x8xf32> to vector<1x8x8xf32>
      %26 = vector.broadcast %25 : vector<1x8x8xf32> to vector<4x8x8xf32>
      %27 = arith.mulf %17, %26 : vector<4x8x8xf32>
      %28 = vector.shape_cast %19 : vector<8x8xf32> to vector<1x8x8xf32>
      %29 = vector.broadcast %28 : vector<1x8x8xf32> to vector<4x8x8xf32>
      %30 = arith.mulf %24, %29 : vector<4x8x8xf32>
      %31 = arith.addf %27, %30 : vector<4x8x8xf32>
      %32 = arith.truncf %31 : vector<4x8x8xf32> to vector<4x8x8xbf16>
      %c0_22 = arith.constant 0 : index
      %c0_23 = arith.constant 0 : index
      %c0_24 = arith.constant 0 : index
      %33 = vector.load %arg14[%c0_22, %c0_23, %c0_24] : memref<4x8x8xbf16, #tpu.memory_space<vmem>>, vector<4x8x8xbf16>
      tpu.vector_store %arg14[%c0_22, %c0_23, %c0_24], %32 {strides = array<i32>} : memref<4x8x8xbf16, #tpu.memory_space<vmem>>, vector<4x8x8xbf16>,
    } else {
    }
    %3 = arith.cmpi slt, %arg2, %arg1 : i32
    %4 = arith.extui %3 : i1 to i32
    %c0_i32_1 = arith.constant 0 : i32
    %5 = arith.cmpi ne, %4, %c0_i32_1 : i32
    scf.if %5 {
      %c0 = arith.constant 0 : index
      %c0_3 = arith.constant 0 : index
      %c0_4 = arith.constant 0 : index
      %c0_5 = arith.constant 0 : index
      %9 = vector.load %arg4[%c0, %c0_3, %c0_4, %c0_5] : memref<1x4x8x8xbf16, #tpu.memory_space<vmem>>, vector<1x4x8x8xbf16>
      %10 = vector.shape_cast %9 : vector<1x4x8x8xbf16> to vector<4x8x8xbf16>
      %11 = arith.extf %10 : vector<4x8x8xbf16> to vector<4x8x8xf32>
      %c0_6 = arith.constant 0 : index
      %c0_7 = arith.constant 0 : index
      %12 = vector.load %arg8[%c0_6, %c0_7] : memref<8x8xf32, #tpu.memory_space<vmem>>, vector<8x8xf32>
      %c0_8 = arith.constant 0 : index
      %c0_9 = arith.constant 0 : index
      %13 = vector.load %arg9[%c0_8, %c0_9] : memref<8x8xf32, #tpu.memory_space<vmem>>, vector<8x8xf32>
      %14 = vector.extract_strided_slice %11 {offsets = [0, 0, 4], sizes = [4, 8, 4], strides = [1, 1, 1]} : vector<4x8x8xf32> to vector<4x8x4xf32>
      %cst = arith.constant 0.000000e+00 : f32
      %15 = vector.broadcast %cst : f32 to vector<4x8x4xf32>
      %16 = arith.subf %15, %14 : vector<4x8x4xf32>
      %17 = vector.extract_strided_slice %11 {offsets = [0, 0, 0], sizes = [4, 8, 4], strides = [1, 1, 1]} : vector<4x8x8xf32> to vector<4x8x4xf32>
      %18 = tpu.concatenate %16, %17 in 2 : vector<4x8x4xf32>, vector<4x8x4xf32> -> vector<4x8x8xf32>
      %19 = vector.shape_cast %12 : vector<8x8xf32> to vector<1x8x8xf32>
      %20 = vector.broadcast %19 : vector<1x8x8xf32> to vector<4x8x8xf32>
      %21 = arith.mulf %11, %20 : vector<4x8x8xf32>
      %22 = vector.shape_cast %13 : vector<8x8xf32> to vector<1x8x8xf32>
      %23 = vector.broadcast %22 : vector<1x8x8xf32> to vector<4x8x8xf32>
      %24 = arith.mulf %18, %23 : vector<4x8x8xf32>
      %25 = arith.addf %21, %24 : vector<4x8x8xf32>
      %26 = arith.truncf %25 : vector<4x8x8xf32> to vector<4x8x8xbf16>
      %c0_10 = arith.constant 0 : index
      %c0_11 = arith.constant 0 : index
      %c0_12 = arith.constant 0 : index
      %c0_13 = arith.constant 0 : index
      %27 = vector.load %arg5[%c0_10, %c0_11, %c0_12, %c0_13] : memref<1x4x8x8xbf16, #tpu.memory_space<vmem>>, vector<1x4x8x8xbf16>
      %28 = vector.shape_cast %27 : vector<1x4x8x8xbf16> to vector<4x8x8xbf16>
      %c0_14 = arith.constant 0 : index
      %c0_15 = arith.constant 0 : index
      %c0_16 = arith.constant 0 : index
      %29 = vector.load %arg14[%c0_14, %c0_15, %c0_16] : memref<4x8x8xbf16, #tpu.memory_space<vmem>>, vector<4x8x8xbf16>
      "tpu.trace_start"() <{level = 10 : i32, message = "hqd,hkd->hqk"}> : () -> ()
      %cst_17 = arith.constant dense<0.000000e+00> : vector<4x8x8xf32>
      %30 = tpu.matmul %29, %26, %cst_17 {dimension_numbers = #tpu.dot_dimension_numbers<[2], [2], [1], [1], [0, 0, 0, 1, 1, 1], [0], [0]>} : vector<4x8x8xbf16>, vector<4x8x8xbf16>, vector<4x8x8xf32> -> vector<4x8x8xf32>
      "tpu.trace_stop"() : () -> ()
      %c0_18 = arith.constant 0 : index
      %c0_19 = arith.constant 0 : index
      %c0_20 = arith.constant 0 : index
      %31 = vector.load %arg11[%c0_18, %c0_19, %c0_20] : memref<4x8x1xf32, #tpu.memory_space<vmem>>, vector<4x8x1xf32>
      %cst_21 = arith.constant dense<0xFF800000> : vector<4x8xf32>
      %32 = vector.multi_reduction <maximumf>, %30, %cst_21 [2] : vector<4x8x8xf32> to vector<4x8xf32>
      %33 = vector.shape_cast %32 : vector<4x8xf32> to vector<4x8x1xf32>
      %34 = arith.maximumf %31, %33 : vector<4x8x1xf32>
      %c0_22 = arith.constant 0 : index
      %c0_23 = arith.constant 0 : index
      %c0_24 = arith.constant 0 : index
      %35 = vector.load %arg11[%c0_22, %c0_23, %c0_24] : memref<4x8x1xf32, #tpu.memory_space<vmem>>, vector<4x8x1xf32>
      %36 = arith.subf %35, %34 : vector<4x8x1xf32>
      %37 = math.exp %36 : vector<4x8x1xf32>
      %38 = vector.broadcast %34 : vector<4x8x1xf32> to vector<4x8x8xf32>
      %39 = arith.subf %30, %38 : vector<4x8x8xf32>
      %40 = math.exp %39 : vector<4x8x8xf32>
      %c0_25 = arith.constant 0 : index
      %c0_26 = arith.constant 0 : index
      %c0_27 = arith.constant 0 : index
      %41 = vector.load %arg12[%c0_25, %c0_26, %c0_27] : memref<4x8x1xf32, #tpu.memory_space<vmem>>, vector<4x8x1xf32>
      %42 = arith.mulf %37, %41 : vector<4x8x1xf32>
      %cst_28 = arith.constant dense<0.000000e+00> : vector<4x8xf32>
      %43 = vector.multi_reduction <add>, %40, %cst_28 [2] : vector<4x8x8xf32> to vector<4x8xf32>
      %44 = vector.shape_cast %43 : vector<4x8xf32> to vector<4x8x1xf32>
      %45 = arith.addf %42, %44 : vector<4x8x1xf32>
      %c0_29 = arith.constant 0 : index
      %c0_30 = arith.constant 0 : index
      %c0_31 = arith.constant 0 : index
      %46 = vector.load %arg12[%c0_29, %c0_30, %c0_31] : memref<4x8x1xf32, #tpu.memory_space<vmem>>, vector<4x8x1xf32>
      tpu.vector_store %arg12[%c0_29, %c0_30, %c0_31], %45 {strides = array<i32>} : memref<4x8x1xf32, #tpu.memory_space<vmem>>, vector<4x8x1xf32>,
      %c0_32 = arith.constant 0 : index
      %c0_33 = arith.constant 0 : index
      %c0_34 = arith.constant 0 : index
      %47 = vector.load %arg13[%c0_32, %c0_33, %c0_34] : memref<4x8x8xf32, #tpu.memory_space<vmem>>, vector<4x8x8xf32>
      %48 = vector.broadcast %37 : vector<4x8x1xf32> to vector<4x8x8xf32>
      %49 = arith.mulf %48, %47 : vector<4x8x8xf32>
      %50 = arith.truncf %40 : vector<4x8x8xf32> to vector<4x8x8xbf16>
      "tpu.trace_start"() <{level = 10 : i32, message = "hqk,hkd->hqd"}> : () -> ()
      %cst_35 = arith.constant dense<0.000000e+00> : vector<4x8x8xf32>
      %51 = tpu.matmul %50, %28, %cst_35 {dimension_numbers = #tpu.dot_dimension_numbers<[2], [1], [1], [2], [0, 0, 0, 1, 1, 2], [0], [0]>} : vector<4x8x8xbf16>, vector<4x8x8xbf16>, vector<4x8x8xf32> -> vector<4x8x8xf32>
      "tpu.trace_stop"() : () -> ()
      %52 = arith.addf %49, %51 : vector<4x8x8xf32>
      %c0_36 = arith.constant 0 : index
      %c0_37 = arith.constant 0 : index
      %c0_38 = arith.constant 0 : index
      %53 = vector.load %arg13[%c0_36, %c0_37, %c0_38] : memref<4x8x8xf32, #tpu.memory_space<vmem>>, vector<4x8x8xf32>
      tpu.vector_store %arg13[%c0_36, %c0_37, %c0_38], %52 {strides = array<i32>} : memref<4x8x8xf32, #tpu.memory_space<vmem>>, vector<4x8x8xf32>,
      %c0_39 = arith.constant 0 : index
      %c0_40 = arith.constant 0 : index
      %c0_41 = arith.constant 0 : index
      %54 = vector.load %arg11[%c0_39, %c0_40, %c0_41] : memref<4x8x1xf32, #tpu.memory_space<vmem>>, vector<4x8x1xf32>
      tpu.vector_store %arg11[%c0_39, %c0_40, %c0_41], %34 {strides = array<i32>} : memref<4x8x1xf32, #tpu.memory_space<vmem>>, vector<4x8x1xf32>,
    } else {
    }
    %6 = arith.cmpi eq, %arg2, %arg1 : i32
    %7 = arith.extui %6 : i1 to i32
    %c0_i32_2 = arith.constant 0 : i32
    %8 = arith.cmpi ne, %7, %c0_i32_2 : i32
    scf.if %8 {
      %c0 = arith.constant 0 : index
      %c0_3 = arith.constant 0 : index
      %c0_4 = arith.constant 0 : index
      %c0_5 = arith.constant 0 : index
      %9 = vector.load %arg4[%c0, %c0_3, %c0_4, %c0_5] : memref<1x4x8x8xbf16, #tpu.memory_space<vmem>>, vector<1x4x8x8xbf16>
      %10 = vector.shape_cast %9 : vector<1x4x8x8xbf16> to vector<4x8x8xbf16>
      %11 = arith.extf %10 : vector<4x8x8xbf16> to vector<4x8x8xf32>
      %c0_6 = arith.constant 0 : index
      %c0_7 = arith.constant 0 : index
      %12 = vector.load %arg8[%c0_6, %c0_7] : memref<8x8xf32, #tpu.memory_space<vmem>>, vector<8x8xf32>
      %c0_8 = arith.constant 0 : index
      %c0_9 = arith.constant 0 : index
      %13 = vector.load %arg9[%c0_8, %c0_9] : memref<8x8xf32, #tpu.memory_space<vmem>>, vector<8x8xf32>
      %14 = vector.extract_strided_slice %11 {offsets = [0, 0, 4], sizes = [4, 8, 4], strides = [1, 1, 1]} : vector<4x8x8xf32> to vector<4x8x4xf32>
      %cst = arith.constant 0.000000e+00 : f32
      %15 = vector.broadcast %cst : f32 to vector<4x8x4xf32>
      %16 = arith.subf %15, %14 : vector<4x8x4xf32>
      %17 = vector.extract_strided_slice %11 {offsets = [0, 0, 0], sizes = [4, 8, 4], strides = [1, 1, 1]} : vector<4x8x8xf32> to vector<4x8x4xf32>
      %18 = tpu.concatenate %16, %17 in 2 : vector<4x8x4xf32>, vector<4x8x4xf32> -> vector<4x8x8xf32>
      %19 = vector.shape_cast %12 : vector<8x8xf32> to vector<1x8x8xf32>
      %20 = vector.broadcast %19 : vector<1x8x8xf32> to vector<4x8x8xf32>
      %21 = arith.mulf %11, %20 : vector<4x8x8xf32>
      %22 = vector.shape_cast %13 : vector<8x8xf32> to vector<1x8x8xf32>
      %23 = vector.broadcast %22 : vector<1x8x8xf32> to vector<4x8x8xf32>
      %24 = arith.mulf %18, %23 : vector<4x8x8xf32>
      %25 = arith.addf %21, %24 : vector<4x8x8xf32>
      %26 = arith.truncf %25 : vector<4x8x8xf32> to vector<4x8x8xbf16>
      %c0_10 = arith.constant 0 : index
      %c0_11 = arith.constant 0 : index
      %c0_12 = arith.constant 0 : index
      %c0_13 = arith.constant 0 : index
      %27 = vector.load %arg5[%c0_10, %c0_11, %c0_12, %c0_13] : memref<1x4x8x8xbf16, #tpu.memory_space<vmem>>, vector<1x4x8x8xbf16>
      %28 = vector.shape_cast %27 : vector<1x4x8x8xbf16> to vector<4x8x8xbf16>
      %c0_14 = arith.constant 0 : index
      %c0_15 = arith.constant 0 : index
      %c0_16 = arith.constant 0 : index
      %29 = vector.load %arg14[%c0_14, %c0_15, %c0_16] : memref<4x8x8xbf16, #tpu.memory_space<vmem>>, vector<4x8x8xbf16>
      "tpu.trace_start"() <{level = 10 : i32, message = "hqd,hkd->hqk"}> : () -> ()
      %cst_17 = arith.constant dense<0.000000e+00> : vector<4x8x8xf32>
      %30 = tpu.matmul %29, %26, %cst_17 {dimension_numbers = #tpu.dot_dimension_numbers<[2], [2], [1], [1], [0, 0, 0, 1, 1, 1], [0], [0]>} : vector<4x8x8xbf16>, vector<4x8x8xbf16>, vector<4x8x8xf32> -> vector<4x8x8xf32>
      "tpu.trace_stop"() : () -> ()
      %31 = tpu.iota {dimensions = array<i32: 1>} : vector<4x8x8xi32>
      %32 = tpu.iota {dimensions = array<i32: 2>} : vector<4x8x8xi32>
      %33 = arith.cmpi sle, %32, %31 : vector<4x8x8xi32>
      %cst_18 = arith.constant 0xFF800000 : f32
      %34 = vector.broadcast %cst_18 : f32 to vector<4x8x8xf32>
      %35 = arith.select %33, %30, %34 : vector<4x8x8xi1>, vector<4x8x8xf32>
      %c0_19 = arith.constant 0 : index
      %c0_20 = arith.constant 0 : index
      %c0_21 = arith.constant 0 : index
      %36 = vector.load %arg11[%c0_19, %c0_20, %c0_21] : memref<4x8x1xf32, #tpu.memory_space<vmem>>, vector<4x8x1xf32>
      %cst_22 = arith.constant dense<0xFF800000> : vector<4x8xf32>
      %37 = vector.multi_reduction <maximumf>, %35, %cst_22 [2] : vector<4x8x8xf32> to vector<4x8xf32>
      %38 = vector.shape_cast %37 : vector<4x8xf32> to vector<4x8x1xf32>
      %39 = arith.maximumf %36, %38 : vector<4x8x1xf32>
      %c0_23 = arith.constant 0 : index
      %c0_24 = arith.constant 0 : index
      %c0_25 = arith.constant 0 : index
      %40 = vector.load %arg11[%c0_23, %c0_24, %c0_25] : memref<4x8x1xf32, #tpu.memory_space<vmem>>, vector<4x8x1xf32>
      %41 = arith.subf %40, %39 : vector<4x8x1xf32>
      %42 = math.exp %41 : vector<4x8x1xf32>
      %43 = vector.broadcast %39 : vector<4x8x1xf32> to vector<4x8x8xf32>
      %44 = arith.subf %35, %43 : vector<4x8x8xf32>
      %45 = math.exp %44 : vector<4x8x8xf32>
      %c0_26 = arith.constant 0 : index
      %c0_27 = arith.constant 0 : index
      %c0_28 = arith.constant 0 : index
      %46 = vector.load %arg12[%c0_26, %c0_27, %c0_28] : memref<4x8x1xf32, #tpu.memory_space<vmem>>, vector<4x8x1xf32>
      %47 = arith.mulf %42, %46 : vector<4x8x1xf32>
      %cst_29 = arith.constant dense<0.000000e+00> : vector<4x8xf32>
      %48 = vector.multi_reduction <add>, %45, %cst_29 [2] : vector<4x8x8xf32> to vector<4x8xf32>
      %49 = vector.shape_cast %48 : vector<4x8xf32> to vector<4x8x1xf32>
      %50 = arith.addf %47, %49 : vector<4x8x1xf32>
      %c0_30 = arith.constant 0 : index
      %c0_31 = arith.constant 0 : index
      %c0_32 = arith.constant 0 : index
      %51 = vector.load %arg12[%c0_30, %c0_31, %c0_32] : memref<4x8x1xf32, #tpu.memory_space<vmem>>, vector<4x8x1xf32>
      tpu.vector_store %arg12[%c0_30, %c0_31, %c0_32], %50 {strides = array<i32>} : memref<4x8x1xf32, #tpu.memory_space<vmem>>, vector<4x8x1xf32>,
      %c0_33 = arith.constant 0 : index
      %c0_34 = arith.constant 0 : index
      %c0_35 = arith.constant 0 : index
      %52 = vector.load %arg13[%c0_33, %c0_34, %c0_35] : memref<4x8x8xf32, #tpu.memory_space<vmem>>, vector<4x8x8xf32>
      %53 = vector.broadcast %42 : vector<4x8x1xf32> to vector<4x8x8xf32>
      %54 = arith.mulf %53, %52 : vector<4x8x8xf32>
      %55 = arith.truncf %45 : vector<4x8x8xf32> to vector<4x8x8xbf16>
      "tpu.trace_start"() <{level = 10 : i32, message = "hqk,hkd->hqd"}> : () -> ()
      %cst_36 = arith.constant dense<0.000000e+00> : vector<4x8x8xf32>
      %56 = tpu.matmul %55, %28, %cst_36 {dimension_numbers = #tpu.dot_dimension_numbers<[2], [1], [1], [2], [0, 0, 0, 1, 1, 2], [0], [0]>} : vector<4x8x8xbf16>, vector<4x8x8xbf16>, vector<4x8x8xf32> -> vector<4x8x8xf32>
      "tpu.trace_stop"() : () -> ()
      %57 = arith.addf %54, %56 : vector<4x8x8xf32>
      %c0_37 = arith.constant 0 : index
      %c0_38 = arith.constant 0 : index
      %c0_39 = arith.constant 0 : index
      %58 = vector.load %arg13[%c0_37, %c0_38, %c0_39] : memref<4x8x8xf32, #tpu.memory_space<vmem>>, vector<4x8x8xf32>
      tpu.vector_store %arg13[%c0_37, %c0_38, %c0_39], %57 {strides = array<i32>} : memref<4x8x8xf32, #tpu.memory_space<vmem>>, vector<4x8x8xf32>,
      %c0_40 = arith.constant 0 : index
      %c0_41 = arith.constant 0 : index
      %c0_42 = arith.constant 0 : index
      %59 = vector.load %arg11[%c0_40, %c0_41, %c0_42] : memref<4x8x1xf32, #tpu.memory_space<vmem>>, vector<4x8x1xf32>
      tpu.vector_store %arg11[%c0_40, %c0_41, %c0_42], %39 {strides = array<i32>} : memref<4x8x1xf32, #tpu.memory_space<vmem>>, vector<4x8x1xf32>,
      %c0_43 = arith.constant 0 : index
      %c0_44 = arith.constant 0 : index
      %c0_45 = arith.constant 0 : index
      %60 = vector.load %arg12[%c0_43, %c0_44, %c0_45] : memref<4x8x1xf32, #tpu.memory_space<vmem>>, vector<4x8x1xf32>
      %61 = tpu.reciprocal %60 {approx = true} : vector<4x8x1xf32> -> vector<4x8x1xf32>
      %c0_46 = arith.constant 0 : index
      %c0_47 = arith.constant 0 : index
      %c0_48 = arith.constant 0 : index
      %62 = vector.load %arg13[%c0_46, %c0_47, %c0_48] : memref<4x8x8xf32, #tpu.memory_space<vmem>>, vector<1x8x8xf32>
      %63 = vector.shape_cast %62 : vector<1x8x8xf32> to vector<8x8xf32>
      %64 = vector.extract_strided_slice %61 {offsets = [0, 0, 0], sizes = [1, 8, 1], strides = [1, 1, 1]} : vector<4x8x1xf32> to vector<1x8x1xf32>
      %65 = vector.shape_cast %64 : vector<1x8x1xf32> to vector<8x1xf32>
      %66 = vector.broadcast %65 : vector<8x1xf32> to vector<8x8xf32>
      %67 = arith.mulf %63, %66 : vector<8x8xf32>
      %c1 = arith.constant 1 : index
      %c0_49 = arith.constant 0 : index
      %c0_50 = arith.constant 0 : index
      %68 = vector.load %arg13[%c1, %c0_49, %c0_50] : memref<4x8x8xf32, #tpu.memory_space<vmem>>, vector<1x8x8xf32>
      %69 = vector.shape_cast %68 : vector<1x8x8xf32> to vector<8x8xf32>
      %70 = vector.extract_strided_slice %61 {offsets = [1, 0, 0], sizes = [1, 8, 1], strides = [1, 1, 1]} : vector<4x8x1xf32> to vector<1x8x1xf32>
      %71 = vector.shape_cast %70 : vector<1x8x1xf32> to vector<8x1xf32>
      %72 = vector.broadcast %71 : vector<8x1xf32> to vector<8x8xf32>
      %73 = arith.mulf %69, %72 : vector<8x8xf32>
      %c2 = arith.constant 2 : index
      %c0_51 = arith.constant 0 : index
      %c0_52 = arith.constant 0 : index
      %74 = vector.load %arg13[%c2, %c0_51, %c0_52] : memref<4x8x8xf32, #tpu.memory_space<vmem>>, vector<1x8x8xf32>
      %75 = vector.shape_cast %74 : vector<1x8x8xf32> to vector<8x8xf32>
      %76 = vector.extract_strided_slice %61 {offsets = [2, 0, 0], sizes = [1, 8, 1], strides = [1, 1, 1]} : vector<4x8x1xf32> to vector<1x8x1xf32>
      %77 = vector.shape_cast %76 : vector<1x8x1xf32> to vector<8x1xf32>
      %78 = vector.broadcast %77 : vector<8x1xf32> to vector<8x8xf32>
      %79 = arith.mulf %75, %78 : vector<8x8xf32>
      %c3 = arith.constant 3 : index
      %c0_53 = arith.constant 0 : index
      %c0_54 = arith.constant 0 : index
      %80 = vector.load %arg13[%c3, %c0_53, %c0_54] : memref<4x8x8xf32, #tpu.memory_space<vmem>>, vector<1x8x8xf32>
      %81 = vector.shape_cast %80 : vector<1x8x8xf32> to vector<8x8xf32>
      %82 = vector.extract_strided_slice %61 {offsets = [3, 0, 0], sizes = [1, 8, 1], strides = [1, 1, 1]} : vector<4x8x1xf32> to vector<1x8x1xf32>
      %83 = vector.shape_cast %82 : vector<1x8x1xf32> to vector<8x1xf32>
      %84 = vector.broadcast %83 : vector<8x1xf32> to vector<8x8xf32>
      %85 = arith.mulf %81, %84 : vector<8x8xf32>
      %86 = tpu.concatenate %67, %73, %79, %85 in 1 : vector<8x8xf32>, vector<8x8xf32>, vector<8x8xf32>, vector<8x8xf32> -> vector<8x32xf32>
      %87 = arith.truncf %86 : vector<8x32xf32> to vector<8x32xbf16>
      %c0_55 = arith.constant 0 : index
      %c0_56 = arith.constant 0 : index
      %c0_57 = arith.constant 0 : index
      %88 = vector.load %arg10[%c0_55, %c0_56, %c0_57] : memref<1x8x32xbf16, #tpu.memory_space<vmem>>, vector<1x8x32xbf16>
      %89 = vector.shape_cast %88 : vector<1x8x32xbf16> to vector<8x32xbf16>
      %90 = vector.shape_cast %87 : vector<8x32xbf16> to vector<1x8x32xbf16>
      tpu.vector_store %arg10[%c0_55, %c0_56, %c0_57], %90 {strides = array<i32>} : memref<1x8x32xbf16, #tpu.memory_space<vmem>>, vector<1x8x32xbf16>,
    } else {
    }
    return
  }
  func.func @transform_0(%arg0: i32, %arg1: i32, %arg2: i32) -> (i32, i32, i32, i32) {
    %c0_i32 = arith.constant 0 : i32
    %c0_i32_0 = arith.constant 0 : i32
    %c0_i32_1 = arith.constant 0 : i32
    return %arg0, %c0_i32, %arg1, %c0_i32_0 : i32, i32, i32, i32
  }
  func.func @transform_1(%arg0: i32, %arg1: i32, %arg2: i32) -> (i32, i32, i32, i32) {
    %0 = arith.minsi %arg2, %arg1 : i32
    %c0_i32 = arith.constant 0 : i32
    %c0_i32_0 = arith.constant 0 : i32
    %c0_i32_1 = arith.constant 0 : i32
    return %arg0, %c0_i32, %0, %c0_i32_0 : i32, i32, i32, i32
  }
  func.func @transform_2(%arg0: i32, %arg1: i32, %arg2: i32) -> (i32, i32, i32, i32) {
    %0 = arith.minsi %arg2, %arg1 : i32
    %c0_i32 = arith.constant 0 : i32
    %c0_i32_0 = arith.constant 0 : i32
    %c0_i32_1 = arith.constant 0 : i32
    return %arg0, %c0_i32, %0, %c0_i32_0 : i32, i32, i32, i32
  }
  func.func @transform_3(%arg0: i32, %arg1: i32, %arg2: i32) -> (i32, i32) {
    %c0_i32 = arith.constant 0 : i32
    %c0_i32_0 = arith.constant 0 : i32
    return %arg1, %c0_i32 : i32, i32
  }
  func.func @transform_4(%arg0: i32, %arg1: i32, %arg2: i32) -> (i32, i32) {
    %c0_i32 = arith.constant 0 : i32
    %c0_i32_0 = arith.constant 0 : i32
    return %arg1, %c0_i32 : i32, i32
  }
  func.func @transform_5(%arg0: i32, %arg1: i32, %arg2: i32) -> (i32, i32) {
    %0 = arith.minsi %arg2, %arg1 : i32
    %c0_i32 = arith.constant 0 : i32
    %c0_i32_0 = arith.constant 0 : i32
    return %0, %c0_i32 : i32, i32
  }
  func.func @transform_6(%arg0: i32, %arg1: i32, %arg2: i32) -> (i32, i32) {
    %0 = arith.minsi %arg2, %arg1 : i32
    %c0_i32 = arith.constant 0 : i32
    %c0_i32_0 = arith.constant 0 : i32
    return %0, %c0_i32 : i32, i32
  }
  func.func @transform_7(%arg0: i32, %arg1: i32, %arg2: i32) -> (i32, i32, i32) {
    %c0_i32 = arith.constant 0 : i32
    %c0_i32_0 = arith.constant 0 : i32
    return %arg0, %arg1, %c0_i32 : i32, i32, i32
  }
}

module attributes {stable_mosaic.version = 11 : i64} {
  func.func @_add_rmsnorm_kernel(%arg0: i32, %arg1: memref<16x32xbf16, #tpu.memory_space<vmem>>, %arg2: memref<16x32xbf16, #tpu.memory_space<vmem>>, %arg3: memref<1x32xf32, #tpu.memory_space<vmem>>, %arg4: memref<16x32xbf16, #tpu.memory_space<vmem>>, %arg5: memref<16x32xbf16, #tpu.memory_space<vmem>>) attributes {dimension_semantics = [#tpu.dimension_semantics<parallel>], iteration_bounds = array<i64: 1>, scalar_prefetch = 0 : i64, scratch_operands = 0 : i64, tpu.core_type = #tpu.core_type<tc>, window_params = [{transform_indices = @transform_0, window_bounds = array<i64: 16, 32>}, {transform_indices = @transform_1, window_bounds = array<i64: 16, 32>}, {pipeline_mode = #tpu.pipeline_mode<synchronous>, transform_indices = @transform_2, window_bounds = array<i64: 1, 32>}, {transform_indices = @transform_3, window_bounds = array<i64: 16, 32>}, {transform_indices = @transform_4, window_bounds = array<i64: 16, 32>}]} {
    %c0 = arith.constant 0 : index
    %c0_0 = arith.constant 0 : index
    %0 = vector.load %arg1[%c0, %c0_0] : memref<16x32xbf16, #tpu.memory_space<vmem>>, vector<16x32xbf16>
    %1 = arith.extf %0 : vector<16x32xbf16> to vector<16x32xf32>
    %c0_1 = arith.constant 0 : index
    %c0_2 = arith.constant 0 : index
    %2 = vector.load %arg2[%c0_1, %c0_2] : memref<16x32xbf16, #tpu.memory_space<vmem>>, vector<16x32xbf16>
    %3 = arith.extf %2 : vector<16x32xbf16> to vector<16x32xf32>
    %4 = arith.addf %1, %3 : vector<16x32xf32>
    %5 = arith.truncf %4 : vector<16x32xf32> to vector<16x32xbf16>
    %c0_3 = arith.constant 0 : index
    %c0_4 = arith.constant 0 : index
    %6 = vector.load %arg4[%c0_3, %c0_4] : memref<16x32xbf16, #tpu.memory_space<vmem>>, vector<16x32xbf16>
    tpu.vector_store %arg4[%c0_3, %c0_4], %5 {strides = array<i32>} : memref<16x32xbf16, #tpu.memory_space<vmem>>, vector<16x32xbf16>,
    %7 = arith.mulf %4, %4 : vector<16x32xf32>
    %cst = arith.constant dense<0.000000e+00> : vector<16xf32>
    %8 = vector.multi_reduction <add>, %7, %cst [1] : vector<16x32xf32> to vector<16xf32>
    %9 = vector.shape_cast %8 : vector<16xf32> to vector<16x1xf32>
    %cst_5 = arith.constant 3.200000e+01 : f32
    %10 = vector.broadcast %cst_5 : f32 to vector<16x1xf32>
    %11 = arith.divf %9, %10 : vector<16x1xf32>
    %cst_6 = arith.constant 9.99999974E-6 : f32
    %12 = vector.broadcast %cst_6 : f32 to vector<16x1xf32>
    %13 = arith.addf %11, %12 : vector<16x1xf32>
    %14 = math.rsqrt %13 : vector<16x1xf32>
    %15 = vector.broadcast %14 : vector<16x1xf32> to vector<16x32xf32>
    %16 = arith.mulf %4, %15 : vector<16x32xf32>
    %c0_7 = arith.constant 0 : index
    %c0_8 = arith.constant 0 : index
    %17 = vector.load %arg3[%c0_7, %c0_8] : memref<1x32xf32, #tpu.memory_space<vmem>>, vector<1x32xf32>
    %18 = vector.broadcast %17 : vector<1x32xf32> to vector<16x32xf32>
    %19 = arith.mulf %16, %18 : vector<16x32xf32>
    %20 = arith.truncf %19 : vector<16x32xf32> to vector<16x32xbf16>
    %c0_9 = arith.constant 0 : index
    %c0_10 = arith.constant 0 : index
    %21 = vector.load %arg5[%c0_9, %c0_10] : memref<16x32xbf16, #tpu.memory_space<vmem>>, vector<16x32xbf16>
    tpu.vector_store %arg5[%c0_9, %c0_10], %20 {strides = array<i32>} : memref<16x32xbf16, #tpu.memory_space<vmem>>, vector<16x32xbf16>,
    return
  }
  func.func @transform_0(%arg0: i32) -> (i32, i32) {
    %c0_i32 = arith.constant 0 : i32
    %c0_i32_0 = arith.constant 0 : i32
    return %arg0, %c0_i32 : i32, i32
  }
  func.func @transform_1(%arg0: i32) -> (i32, i32) {
    %c0_i32 = arith.constant 0 : i32
    %c0_i32_0 = arith.constant 0 : i32
    return %arg0, %c0_i32 : i32, i32
  }
  func.func @transform_2(%arg0: i32) -> (i32, i32) {
    %c0_i32 = arith.constant 0 : i32
    %c0_i32_0 = arith.constant 0 : i32
    %c0_i32_1 = arith.constant 0 : i32
    return %c0_i32, %c0_i32_0 : i32, i32
  }
  func.func @transform_3(%arg0: i32) -> (i32, i32) {
    %c0_i32 = arith.constant 0 : i32
    %c0_i32_0 = arith.constant 0 : i32
    return %arg0, %c0_i32 : i32, i32
  }
  func.func @transform_4(%arg0: i32) -> (i32, i32) {
    %c0_i32 = arith.constant 0 : i32
    %c0_i32_0 = arith.constant 0 : i32
    return %arg0, %c0_i32 : i32, i32
  }
}

module attributes {stable_mosaic.version = 11 : i64} {
  func.func @_swiglu_kernel(%arg0: i32, %arg1: i32, %arg2: memref<16x32xbf16, #tpu.memory_space<vmem>>, %arg3: memref<32x64xbf16, #tpu.memory_space<vmem>>, %arg4: memref<32x64xbf16, #tpu.memory_space<vmem>>, %arg5: memref<64x32xbf16, #tpu.memory_space<vmem>>, %arg6: memref<16x32xbf16, #tpu.memory_space<vmem>>, %arg7: memref<16x32xf32, #tpu.memory_space<vmem>>) attributes {dimension_semantics = [#tpu.dimension_semantics<parallel>, #tpu.dimension_semantics<arbitrary>], iteration_bounds = array<i64: 1, 1>, scalar_prefetch = 0 : i64, scratch_operands = 1 : i64, tpu.core_type = #tpu.core_type<tc>, window_params = [{transform_indices = @transform_0, window_bounds = array<i64: 16, 32>}, {transform_indices = @transform_1, window_bounds = array<i64: 32, 64>}, {transform_indices = @transform_2, window_bounds = array<i64: 32, 64>}, {transform_indices = @transform_3, window_bounds = array<i64: 64, 32>}, {transform_indices = @transform_4, window_bounds = array<i64: 16, 32>}]} {
    %c0_i32 = arith.constant 0 : i32
    %0 = arith.cmpi eq, %arg1, %c0_i32 : i32
    %1 = arith.extui %0 : i1 to i32
    %c0_i32_0 = arith.constant 0 : i32
    %2 = arith.cmpi ne, %1, %c0_i32_0 : i32
    scf.if %2 {
      %cst_18 = arith.constant 0.000000e+00 : f32
      %25 = vector.broadcast %cst_18 : f32 to vector<16x32xf32>
      %c0_19 = arith.constant 0 : index
      %c0_20 = arith.constant 0 : index
      %26 = vector.load %arg7[%c0_19, %c0_20] : memref<16x32xf32, #tpu.memory_space<vmem>>, vector<16x32xf32>
      tpu.vector_store %arg7[%c0_19, %c0_20], %25 {strides = array<i32>} : memref<16x32xf32, #tpu.memory_space<vmem>>, vector<16x32xf32>,
    } else {
    }
    %c0 = arith.constant 0 : index
    %c0_1 = arith.constant 0 : index
    %3 = vector.load %arg2[%c0, %c0_1] : memref<16x32xbf16, #tpu.memory_space<vmem>>, vector<16x32xbf16>
    %c0_2 = arith.constant 0 : index
    %c0_3 = arith.constant 0 : index
    %4 = vector.load %arg3[%c0_2, %c0_3] : memref<32x64xbf16, #tpu.memory_space<vmem>>, vector<32x64xbf16>
    %cst = arith.constant dense<0.000000e+00> : vector<16x64xf32>
    %5 = tpu.matmul %3, %4, %cst {dimension_numbers = #tpu.dot_dimension_numbers<[1], [0], [0], [1], [0, 0, 1, 1], [], []>} : vector<16x32xbf16>, vector<32x64xbf16>, vector<16x64xf32> -> vector<16x64xf32>
    %c0_4 = arith.constant 0 : index
    %c0_5 = arith.constant 0 : index
    %6 = vector.load %arg4[%c0_4, %c0_5] : memref<32x64xbf16, #tpu.memory_space<vmem>>, vector<32x64xbf16>
    %cst_6 = arith.constant dense<0.000000e+00> : vector<16x64xf32>
    %7 = tpu.matmul %3, %6, %cst_6 {dimension_numbers = #tpu.dot_dimension_numbers<[1], [0], [0], [1], [0, 0, 1, 1], [], []>} : vector<16x32xbf16>, vector<32x64xbf16>, vector<16x64xf32> -> vector<16x64xf32>
    %cst_7 = arith.constant 0.000000e+00 : f32
    %8 = vector.broadcast %cst_7 : f32 to vector<16x64xf32>
    %9 = arith.subf %8, %5 : vector<16x64xf32>
    %10 = math.exp %9 : vector<16x64xf32>
    %cst_8 = arith.constant 1.000000e+00 : f32
    %11 = vector.broadcast %cst_8 : f32 to vector<16x64xf32>
    %12 = arith.addf %11, %10 : vector<16x64xf32>
    %13 = tpu.reciprocal %12 {approx = true} : vector<16x64xf32> -> vector<16x64xf32>
    %14 = arith.mulf %5, %13 : vector<16x64xf32>
    %15 = arith.mulf %14, %7 : vector<16x64xf32>
    %c0_9 = arith.constant 0 : index
    %c0_10 = arith.constant 0 : index
    %16 = vector.load %arg7[%c0_9, %c0_10] : memref<16x32xf32, #tpu.memory_space<vmem>>, vector<16x32xf32>
    %17 = arith.truncf %15 : vector<16x64xf32> to vector<16x64xbf16>
    %c0_11 = arith.constant 0 : index
    %c0_12 = arith.constant 0 : index
    %18 = vector.load %arg5[%c0_11, %c0_12] : memref<64x32xbf16, #tpu.memory_space<vmem>>, vector<64x32xbf16>
    %cst_13 = arith.constant dense<0.000000e+00> : vector<16x32xf32>
    %19 = tpu.matmul %17, %18, %cst_13 {dimension_numbers = #tpu.dot_dimension_numbers<[1], [0], [0], [1], [0, 0, 1, 1], [], []>} : vector<16x64xbf16>, vector<64x32xbf16>, vector<16x32xf32> -> vector<16x32xf32>
    %20 = arith.addf %16, %19 : vector<16x32xf32>
    %c0_14 = arith.constant 0 : index
    %c0_15 = arith.constant 0 : index
    %21 = vector.load %arg7[%c0_14, %c0_15] : memref<16x32xf32, #tpu.memory_space<vmem>>, vector<16x32xf32>
    tpu.vector_store %arg7[%c0_14, %c0_15], %20 {strides = array<i32>} : memref<16x32xf32, #tpu.memory_space<vmem>>, vector<16x32xf32>,
    %c0_i32_16 = arith.constant 0 : i32
    %22 = arith.cmpi eq, %arg1, %c0_i32_16 : i32
    %23 = arith.extui %22 : i1 to i32
    %c0_i32_17 = arith.constant 0 : i32
    %24 = arith.cmpi ne, %23, %c0_i32_17 : i32
    scf.if %24 {
      %c0_18 = arith.constant 0 : index
      %c0_19 = arith.constant 0 : index
      %25 = vector.load %arg7[%c0_18, %c0_19] : memref<16x32xf32, #tpu.memory_space<vmem>>, vector<16x32xf32>
      %26 = arith.truncf %25 : vector<16x32xf32> to vector<16x32xbf16>
      %c0_20 = arith.constant 0 : index
      %c0_21 = arith.constant 0 : index
      %27 = vector.load %arg6[%c0_20, %c0_21] : memref<16x32xbf16, #tpu.memory_space<vmem>>, vector<16x32xbf16>
      tpu.vector_store %arg6[%c0_20, %c0_21], %26 {strides = array<i32>} : memref<16x32xbf16, #tpu.memory_space<vmem>>, vector<16x32xbf16>,
    } else {
    }
    return
  }
  func.func @transform_0(%arg0: i32, %arg1: i32) -> (i32, i32) {
    %c0_i32 = arith.constant 0 : i32
    %c0_i32_0 = arith.constant 0 : i32
    return %arg0, %c0_i32 : i32, i32
  }
  func.func @transform_1(%arg0: i32, %arg1: i32) -> (i32, i32) {
    %c0_i32 = arith.constant 0 : i32
    %c0_i32_0 = arith.constant 0 : i32
    return %c0_i32, %arg1 : i32, i32
  }
  func.func @transform_2(%arg0: i32, %arg1: i32) -> (i32, i32) {
    %c0_i32 = arith.constant 0 : i32
    %c0_i32_0 = arith.constant 0 : i32
    return %c0_i32, %arg1 : i32, i32
  }
  func.func @transform_3(%arg0: i32, %arg1: i32) -> (i32, i32) {
    %c0_i32 = arith.constant 0 : i32
    %c0_i32_0 = arith.constant 0 : i32
    return %arg1, %c0_i32 : i32, i32
  }
  func.func @transform_4(%arg0: i32, %arg1: i32) -> (i32, i32) {
    %c0_i32 = arith.constant 0 : i32
    %c0_i32_0 = arith.constant 0 : i32
    return %arg0, %c0_i32 : i32, i32
  }
}

module attributes {stable_mosaic.version = 11 : i64} {
  func.func @_add_rmsnorm_kernel(%arg0: i32, %arg1: memref<16x32xbf16, #tpu.memory_space<vmem>>, %arg2: memref<16x32xbf16, #tpu.memory_space<vmem>>, %arg3: memref<1x32xf32, #tpu.memory_space<vmem>>, %arg4: memref<16x32xbf16, #tpu.memory_space<vmem>>, %arg5: memref<16x32xbf16, #tpu.memory_space<vmem>>) attributes {dimension_semantics = [#tpu.dimension_semantics<parallel>], iteration_bounds = array<i64: 1>, scalar_prefetch = 0 : i64, scratch_operands = 0 : i64, tpu.core_type = #tpu.core_type<tc>, window_params = [{transform_indices = @transform_0, window_bounds = array<i64: 16, 32>}, {transform_indices = @transform_1, window_bounds = array<i64: 16, 32>}, {pipeline_mode = #tpu.pipeline_mode<synchronous>, transform_indices = @transform_2, window_bounds = array<i64: 1, 32>}, {transform_indices = @transform_3, window_bounds = array<i64: 16, 32>}, {transform_indices = @transform_4, window_bounds = array<i64: 16, 32>}]} {
    %c0 = arith.constant 0 : index
    %c0_0 = arith.constant 0 : index
    %0 = vector.load %arg1[%c0, %c0_0] : memref<16x32xbf16, #tpu.memory_space<vmem>>, vector<16x32xbf16>
    %1 = arith.extf %0 : vector<16x32xbf16> to vector<16x32xf32>
    %c0_1 = arith.constant 0 : index
    %c0_2 = arith.constant 0 : index
    %2 = vector.load %arg2[%c0_1, %c0_2] : memref<16x32xbf16, #tpu.memory_space<vmem>>, vector<16x32xbf16>
    %3 = arith.extf %2 : vector<16x32xbf16> to vector<16x32xf32>
    %4 = arith.addf %1, %3 : vector<16x32xf32>
    %5 = arith.truncf %4 : vector<16x32xf32> to vector<16x32xbf16>
    %c0_3 = arith.constant 0 : index
    %c0_4 = arith.constant 0 : index
    %6 = vector.load %arg4[%c0_3, %c0_4] : memref<16x32xbf16, #tpu.memory_space<vmem>>, vector<16x32xbf16>
    tpu.vector_store %arg4[%c0_3, %c0_4], %5 {strides = array<i32>} : memref<16x32xbf16, #tpu.memory_space<vmem>>, vector<16x32xbf16>,
    %7 = arith.mulf %4, %4 : vector<16x32xf32>
    %cst = arith.constant dense<0.000000e+00> : vector<16xf32>
    %8 = vector.multi_reduction <add>, %7, %cst [1] : vector<16x32xf32> to vector<16xf32>
    %9 = vector.shape_cast %8 : vector<16xf32> to vector<16x1xf32>
    %cst_5 = arith.constant 3.200000e+01 : f32
    %10 = vector.broadcast %cst_5 : f32 to vector<16x1xf32>
    %11 = arith.divf %9, %10 : vector<16x1xf32>
    %cst_6 = arith.constant 9.99999974E-6 : f32
    %12 = vector.broadcast %cst_6 : f32 to vector<16x1xf32>
    %13 = arith.addf %11, %12 : vector<16x1xf32>
    %14 = math.rsqrt %13 : vector<16x1xf32>
    %15 = vector.broadcast %14 : vector<16x1xf32> to vector<16x32xf32>
    %16 = arith.mulf %4, %15 : vector<16x32xf32>
    %c0_7 = arith.constant 0 : index
    %c0_8 = arith.constant 0 : index
    %17 = vector.load %arg3[%c0_7, %c0_8] : memref<1x32xf32, #tpu.memory_space<vmem>>, vector<1x32xf32>
    %18 = vector.broadcast %17 : vector<1x32xf32> to vector<16x32xf32>
    %19 = arith.mulf %16, %18 : vector<16x32xf32>
    %20 = arith.truncf %19 : vector<16x32xf32> to vector<16x32xbf16>
    %c0_9 = arith.constant 0 : index
    %c0_10 = arith.constant 0 : index
    %21 = vector.load %arg5[%c0_9, %c0_10] : memref<16x32xbf16, #tpu.memory_space<vmem>>, vector<16x32xbf16>
    tpu.vector_store %arg5[%c0_9, %c0_10], %20 {strides = array<i32>} : memref<16x32xbf16, #tpu.memory_space<vmem>>, vector<16x32xbf16>,
    return
  }
  func.func @transform_0(%arg0: i32) -> (i32, i32) {
    %c0_i32 = arith.constant 0 : i32
    %c0_i32_0 = arith.constant 0 : i32
    return %arg0, %c0_i32 : i32, i32
  }
  func.func @transform_1(%arg0: i32) -> (i32, i32) {
    %c0_i32 = arith.constant 0 : i32
    %c0_i32_0 = arith.constant 0 : i32
    return %arg0, %c0_i32 : i32, i32
  }
  func.func @transform_2(%arg0: i32) -> (i32, i32) {
    %c0_i32 = arith.constant 0 : i32
    %c0_i32_0 = arith.constant 0 : i32
    %c0_i32_1 = arith.constant 0 : i32
    return %c0_i32, %c0_i32_0 : i32, i32
  }
  func.func @transform_3(%arg0: i32) -> (i32, i32) {
    %c0_i32 = arith.constant 0 : i32
    %c0_i32_0 = arith.constant 0 : i32
    return %arg0, %c0_i32 : i32, i32
  }
  func.func @transform_4(%arg0: i32) -> (i32, i32) {
    %c0_i32 = arith.constant 0 : i32
    %c0_i32_0 = arith.constant 0 : i32
    return %arg0, %c0_i32 : i32, i32
  }
}

module attributes {stable_mosaic.version = 11 : i64} {
  func.func @_matmul_kernel(%arg0: i32, %arg1: i32, %arg2: i32, %arg3: memref<16x32xbf16, #tpu.memory_space<vmem>>, %arg4: memref<32x32xbf16, #tpu.memory_space<vmem>>, %arg5: memref<16x32xf32, #tpu.memory_space<vmem>>, %arg6: memref<16x32xf32, #tpu.memory_space<vmem>>) attributes {dimension_semantics = [#tpu.dimension_semantics<parallel>, #tpu.dimension_semantics<parallel>, #tpu.dimension_semantics<arbitrary>], iteration_bounds = array<i64: 1, 1, 1>, scalar_prefetch = 0 : i64, scratch_operands = 1 : i64, tpu.core_type = #tpu.core_type<tc>, window_params = [{transform_indices = @transform_0, window_bounds = array<i64: 16, 32>}, {transform_indices = @transform_1, window_bounds = array<i64: 32, 32>}, {transform_indices = @transform_2, window_bounds = array<i64: 16, 32>}]} {
    %c0_i32 = arith.constant 0 : i32
    %0 = arith.cmpi eq, %arg2, %c0_i32 : i32
    %1 = arith.extui %0 : i1 to i32
    %c0_i32_0 = arith.constant 0 : i32
    %2 = arith.cmpi ne, %1, %c0_i32_0 : i32
    scf.if %2 {
      %cst_10 = arith.constant 0.000000e+00 : f32
      %12 = vector.broadcast %cst_10 : f32 to vector<16x32xf32>
      %c0_11 = arith.constant 0 : index
      %c0_12 = arith.constant 0 : index
      %13 = vector.load %arg6[%c0_11, %c0_12] : memref<16x32xf32, #tpu.memory_space<vmem>>, vector<16x32xf32>
      tpu.vector_store %arg6[%c0_11, %c0_12], %12 {strides = array<i32>} : memref<16x32xf32, #tpu.memory_space<vmem>>, vector<16x32xf32>,
    } else {
    }
    %c0 = arith.constant 0 : index
    %c0_1 = arith.constant 0 : index
    %3 = vector.load %arg6[%c0, %c0_1] : memref<16x32xf32, #tpu.memory_space<vmem>>, vector<16x32xf32>
    %c0_2 = arith.constant 0 : index
    %c0_3 = arith.constant 0 : index
    %4 = vector.load %arg3[%c0_2, %c0_3] : memref<16x32xbf16, #tpu.memory_space<vmem>>, vector<16x32xbf16>
    %c0_4 = arith.constant 0 : index
    %c0_5 = arith.constant 0 : index
    %5 = vector.load %arg4[%c0_4, %c0_5] : memref<32x32xbf16, #tpu.memory_space<vmem>>, vector<32x32xbf16>
    %cst = arith.constant dense<0.000000e+00> : vector<16x32xf32>
    %6 = tpu.matmul %4, %5, %cst {dimension_numbers = #tpu.dot_dimension_numbers<[1], [0], [0], [1], [0, 0, 1, 1], [], []>} : vector<16x32xbf16>, vector<32x32xbf16>, vector<16x32xf32> -> vector<16x32xf32>
    %7 = arith.addf %3, %6 : vector<16x32xf32>
    %c0_6 = arith.constant 0 : index
    %c0_7 = arith.constant 0 : index
    %8 = vector.load %arg6[%c0_6, %c0_7] : memref<16x32xf32, #tpu.memory_space<vmem>>, vector<16x32xf32>
    tpu.vector_store %arg6[%c0_6, %c0_7], %7 {strides = array<i32>} : memref<16x32xf32, #tpu.memory_space<vmem>>, vector<16x32xf32>,
    %c0_i32_8 = arith.constant 0 : i32
    %9 = arith.cmpi eq, %arg2, %c0_i32_8 : i32
    %10 = arith.extui %9 : i1 to i32
    %c0_i32_9 = arith.constant 0 : i32
    %11 = arith.cmpi ne, %10, %c0_i32_9 : i32
    scf.if %11 {
      %c0_10 = arith.constant 0 : index
      %c0_11 = arith.constant 0 : index
      %12 = vector.load %arg6[%c0_10, %c0_11] : memref<16x32xf32, #tpu.memory_space<vmem>>, vector<16x32xf32>
      %c0_12 = arith.constant 0 : index
      %c0_13 = arith.constant 0 : index
      %13 = vector.load %arg5[%c0_12, %c0_13] : memref<16x32xf32, #tpu.memory_space<vmem>>, vector<16x32xf32>
      tpu.vector_store %arg5[%c0_12, %c0_13], %12 {strides = array<i32>} : memref<16x32xf32, #tpu.memory_space<vmem>>, vector<16x32xf32>,
    } else {
    }
    return
  }
  func.func @transform_0(%arg0: i32, %arg1: i32, %arg2: i32) -> (i32, i32) {
    %c0_i32 = arith.constant 0 : i32
    return %arg0, %arg2 : i32, i32
  }
  func.func @transform_1(%arg0: i32, %arg1: i32, %arg2: i32) -> (i32, i32) {
    %c0_i32 = arith.constant 0 : i32
    return %arg2, %arg1 : i32, i32
  }
  func.func @transform_2(%arg0: i32, %arg1: i32, %arg2: i32) -> (i32, i32) {
    %c0_i32 = arith.constant 0 : i32
    return %arg0, %arg1 : i32, i32
  }
}

</mosaic_0001>

<bundles_post_ra>
// kernel: transformer_forward.15
= control target key start
LH: loop header
LB: loop body
LE: loop exit
PB: predicated region body
PF: predicated region fallthrough
CT: control target
= control target key end

     0   :  { %vm16_vm0 = vcmask 785408   ;;  %v138_v0 = vmov 0.0   ;;  %vm139_vm1 = vmmov 0   ;;  %vm44_vm2 = vcmask 261120   ;;  %s174_s1 = inlined_call_operand.vmem [shape: bf16[32,96], index: 1, kind: input, shape index: {}]   ;;  %s175_s0 = inlined_call_operand.vmem [shape: bf16[16,32], index: 0, kind: input, shape index: {}]   ;;  %s176_s2 = inlined_call_operand.vmem [shape: bf16[16,96], index: 2, kind: output, shape index: {}]  }
   0x1   :  { %125 = vmatprep.subr.bf16.mxu0 %v138_v0  ;;  %v135_v1 = vld [vmem:[%s174_s1 + $0x8] sm:$0xff]   ;;  %129 = vmatprep.mubr.msk.bf16.mxu0 %vm139_vm1, %v138_v0  ;;  %17 = vst.msk [vmem:[#allocation2] sm:$0xff] %vm16_vm0, %v138_v0  ;;  %18 = vst.msk [vmem:[#allocation2 + $0x8] sm:$0xff] %vm16_vm0, %v138_v0  ;;  %v136_v2 = vld [vmem:[%s174_s1] sm:$0xff]   ;;  %vm107_vm3 = vcmask 781312  }
   0x2   :  { %126 = vmatpush3.bf16.msra.mxu0 %v135_v1  ;;  %v137_v3 = vld [vmem:[%s175_s0] sm:$0xff]  }
   0x3   :  { %127 = vmatprep.subr.bf16.mxu0 %v138_v0 }
   0x6   :  { %128 = vmatpush3.bf16.msra.mxu0 %v136_v2 }
   0x8   :  { %v19_v4 = vld [vmem:[#allocation2] sm:$0xff]  ;;  %v20_v8 = vld [vmem:[#allocation2 + $0x8] sm:$0xff] }
   0x9   :  { %130 = vmatmul.mubr.msk.bf16.vlgmr.msra.gmra.mxu0 %vm44_vm2, %v137_v3 }
  0xc9   :  { %v82_v5 = vpop.f32.mrf.mxu0 }
  0xca   :  { %v89_v6 = vadd.f32 %v82_v5, %v19_v4 }
  0xcb   :  { %v131_v7 = vpop.f32.mrf.mxu0 }
  0xcc   :  { %92 = vst.msk [vmem:[#allocation2] sm:$0xff] %vm16_vm0, %v89_v6 }
  0xcd   :  { %v85_v9 = vpop.f32.mrf.mxu0 }
  0xce   :  { %v90_v10 = vadd.f32 %v85_v9, %v20_v8 }
  0xcf   :  { %v132_v11 = vpop.f32.mrf.mxu0 }
  0xd0   :  { %93 = vst.msk [vmem:[#allocation2 + $0x8] sm:$0xff] %vm16_vm0, %v90_v10 }
  0xd3   :  { %v97_v12 = vld [vmem:[#allocation2] sm:$0xff] }
  0xd4   :  { %v120_v13 = vpack.c.bf16 %v97_v12, %v97_v12 }
  0xd6   :  { %108 = vst.msk [vmem:[%s176_s2] sm:$0xf] %vm107_vm3, %v120_v13 }
  0xd7   :  { %v98_v14 = vld [vmem:[#allocation2 + $0x8] sm:$0xff] }
  0xd8   :  { %v121_v15 = vpack.c.bf16 %v98_v14, %v98_v14 }
  0xda   :  { %109 = vst.msk [vmem:[%s176_s2 + $0x4] sm:$0xf] %vm107_vm3, %v121_v15 }

// kernel: transformer_forward.14
= control target key start
LH: loop header
LB: loop body
LE: loop exit
PB: predicated region body
PF: predicated region fallthrough
CT: control target
= control target key end

     0   :  { %vm17_vm0 = vcmask 261120   ;;  %vm50_vm1 = vcmask 257024   ;;  %s97_s0 = inlined_call_operand.vmem [shape: bf16[16,32], index: 0, kind: input, shape index: {}]   ;;  %s98_s1 = inlined_call_operand.vmem [shape: f32[1,32], index: 1, kind: input, shape index: {}]   ;;  %s99_s2 = inlined_call_operand.vmem [shape: bf16[16,32], index: 2, kind: output, shape index: {}]  }
   0x1   :  { %v63_v0 = vld [vmem:[%s97_s0] sm:$0xff]  }
   0x2   :  { %v64_v1 = vunpack.c.l.bf16 %v63_v0  ;;  %v65_v2 = vunpack.c.h.bf16 %v63_v0  ;;  %v57_v14 = vld [vmem:[%s98_s1] ss:$0 sm:$0xff] }
   0x4   :  { %v15_v3 = vmul.f32 %v64_v1, %v64_v1  ;;  %v16_v4 = vmul.f32 %v65_v2, %v65_v2 }
   0x6   :  { %v18_v5 = vsel %vm17_vm0, %v15_v3, 0.0  ;;  %v21_v6 = vsel %vm17_vm0, %v16_v4, 0.0 }
   0x7   :  { %19 = vadd.xlane.f32.xlu0 %v18_v5 }
   0xb   :  { %22 = vadd.xlane.f32.xlu0 %v21_v6 }
  0x90   :  { %v20_v7 = vpop.xlane.xlu0 %19 }
  0x91   :  { %v25_v8 = vmul.f32 0.03125, %v20_v7 }
  0x93   :  { %v27_v9 = vadd.f32 1e-05, %v25_v8 }
  0x94   :  { %v23_v10 = vpop.xlane.xlu0 %22 }
  0x95   :  { %66 = vrsqrt.f32 %v27_v9  ;;  %v26_v11 = vmul.f32 0.03125, %v23_v10 }
  0x97   :  { %v28_v12 = vadd.f32 1e-05, %v26_v11 }
  0x99   :  { %68 = vrsqrt.f32 %v28_v12 }
  0xa2   :  { %v67_v13 = vpop.eup %66 }
  0xa3   :  { %v31_v15 = vmul.f32 %v67_v13, %v64_v1 }
  0xa5   :  { %v40_v16 = vmul.f32 %v57_v14, %v31_v15 }
  0xa6   :  { %v69_v17 = vpop.eup %68 }
  0xa7   :  { %v60_v18 = vpack.c.bf16 %v40_v16, %v40_v16  ;;  %v32_v19 = vmul.f32 %v69_v17, %v65_v2 }
  0xa9   :  { %51 = vst.msk [vmem:[%s99_s2] sm:$0xf] %vm50_vm1, %v60_v18  ;;  %v41_v20 = vmul.f32 %v57_v14, %v32_v19 }
  0xab   :  { %v61_v21 = vpack.c.bf16 %v41_v20, %v41_v20 }
  0xad   :  { %52 = vst.msk [vmem:[%s99_s2 + $0x4] sm:$0xf] %vm50_vm1, %v61_v21 }

// kernel: transformer_forward.17
= control target key start
LH: loop header
LB: loop body
LE: loop exit
PB: predicated region body
PF: predicated region fallthrough
CT: control target
= control target key end

     0   :  { %vm16_vm0 = vcmask 261120   ;;  %v137_v0 = vmov 0.0   ;;  %vm138_vm1 = vmmov 0   ;;  %vm106_vm2 = vcmask 257024   ;;  %s174_s1 = inlined_call_operand.vmem [shape: bf16[32,32], index: 1, kind: input, shape index: {}]   ;;  %s175_s0 = inlined_call_operand.vmem [shape: bf16[16,32], index: 0, kind: input, shape index: {}]   ;;  %s176_s2 = inlined_call_operand.vmem [shape: bf16[16,32], index: 2, kind: output, shape index: {}]  }
   0x1   :  { %124 = vmatprep.subr.bf16.mxu0 %v137_v0  ;;  %v134_v1 = vld [vmem:[%s174_s1 + $0x8] sm:$0xff]   ;;  %128 = vmatprep.mubr.msk.bf16.mxu0 %vm138_vm1, %v137_v0  ;;  %17 = vst.msk [vmem:[#allocation2] sm:$0xff] %vm16_vm0, %v137_v0  ;;  %18 = vst.msk [vmem:[#allocation2 + $0x8] sm:$0xff] %vm16_vm0, %v137_v0  ;;  %v135_v2 = vld [vmem:[%s174_s1] sm:$0xff]  }
   0x2   :  { %125 = vmatpush3.bf16.msra.mxu0 %v134_v1  ;;  %v136_v3 = vld [vmem:[%s175_s0] sm:$0xff]  }
   0x3   :  { %126 = vmatprep.subr.bf16.mxu0 %v137_v0 }
   0x6   :  { %127 = vmatpush3.bf16.msra.mxu0 %v135_v2 }
   0x8   :  { %v19_v4 = vld [vmem:[#allocation2] sm:$0xff]  ;;  %v20_v8 = vld [vmem:[#allocation2 + $0x8] sm:$0xff] }
   0x9   :  { %129 = vmatmul.mubr.msk.bf16.vlgmr.msra.gmra.mxu0 %vm16_vm0, %v136_v3 }
  0xc9   :  { %v82_v5 = vpop.f32.mrf.mxu0 }
  0xca   :  { %v89_v6 = vadd.f32 %v82_v5, %v19_v4 }
  0xcb   :  { %v130_v7 = vpop.f32.mrf.mxu0 }
  0xcc   :  { %91 = vst.msk [vmem:[#allocation2] sm:$0xff] %vm16_vm0, %v89_v6 }
  0xcd   :  { %v85_v9 = vpop.f32.mrf.mxu0 }
  0xce   :  { %v90_v10 = vadd.f32 %v85_v9, %v20_v8 }
  0xcf   :  { %v131_v11 = vpop.f32.mrf.mxu0 }
  0xd0   :  { %92 = vst.msk [vmem:[#allocation2 + $0x8] sm:$0xff] %vm16_vm0, %v90_v10 }
  0xd3   :  { %v96_v12 = vld [vmem:[#allocation2] sm:$0xff] }
  0xd4   :  { %v119_v13 = vpack.c.bf16 %v96_v12, %v96_v12 }
  0xd6   :  { %107 = vst.msk [vmem:[%s176_s2] sm:$0xf] %vm106_vm2, %v119_v13 }
  0xd7   :  { %v97_v14 = vld [vmem:[#allocation2 + $0x8] sm:$0xff] }
  0xd8   :  { %v120_v15 = vpack.c.bf16 %v97_v14, %v97_v14 }
  0xda   :  { %108 = vst.msk [vmem:[%s176_s2 + $0x4] sm:$0xf] %vm106_vm2, %v120_v15 }

// kernel: transformer_forward.18
= control target key start
LH: loop header
LB: loop body
LE: loop exit
PB: predicated region body
PF: predicated region fallthrough
CT: control target
= control target key end

     0   :  { %vm39_vm0 = vcmask 261120   ;;  %vm34_vm1 = vcmask 257024   ;;  %s153_s0 = inlined_call_operand.vmem [shape: bf16[16,32], index: 0, kind: input, shape index: {}]   ;;  %s154_s1 = inlined_call_operand.vmem [shape: bf16[16,32], index: 1, kind: input, shape index: {}]   ;;  %s155_s3 = inlined_call_operand.vmem [shape: bf16[16,32], index: 3, kind: output, shape index: {0}]   ;;  %s156_s2 = inlined_call_operand.vmem [shape: f32[1,32], index: 2, kind: input, shape index: {}]   ;;  %s157_s4 = inlined_call_operand.vmem [shape: bf16[16,32], index: 4, kind: output, shape index: {1}]  }
   0x1   :  { %v92_v0 = vld [vmem:[%s153_s0] sm:$0xff]  }
   0x2   :  { %v96_v1 = vld [vmem:[%s154_s1] sm:$0xff]   ;;  %v93_v2 = vunpack.c.l.bf16 %v92_v0  ;;  %v94_v4 = vunpack.c.h.bf16 %v92_v0 }
   0x3   :  { %v97_v3 = vunpack.c.l.bf16 %v96_v1  ;;  %v98_v5 = vunpack.c.h.bf16 %v96_v1  ;;  %v84_v21 = vld [vmem:[%s156_s2] ss:$0 sm:$0xff] }
   0x5   :  { %v24_v6 = vadd.f32 %v97_v3, %v93_v2  ;;  %v25_v7 = vadd.f32 %v98_v5, %v94_v4 }
   0x7   :  { %v37_v8 = vmul.f32 %v24_v6, %v24_v6  ;;  %v87_v9 = vpack.c.bf16 %v24_v6, %v24_v6  ;;  %v88_v10 = vpack.c.bf16 %v25_v7, %v25_v7  ;;  %v38_v11 = vmul.f32 %v25_v7, %v25_v7 }
   0x9   :  { %v40_v12 = vsel %vm39_vm0, %v37_v8, 0.0  ;;  %35 = vst.msk [vmem:[%s155_s3] sm:$0xf] %vm34_vm1, %v87_v9  ;;  %36 = vst.msk [vmem:[%s155_s3 + $0x4] sm:$0xf] %vm34_vm1, %v88_v10  ;;  %v43_v13 = vsel %vm39_vm0, %v38_v11, 0.0 }
   0xa   :  { %41 = vadd.xlane.f32.xlu0 %v40_v12 }
   0xe   :  { %44 = vadd.xlane.f32.xlu0 %v43_v13 }
  0x93   :  { %v42_v14 = vpop.xlane.xlu0 %41 }
  0x94   :  { %v47_v15 = vmul.f32 0.03125, %v42_v14 }
  0x96   :  { %v49_v16 = vadd.f32 1e-05, %v47_v15 }
  0x97   :  { %v45_v17 = vpop.xlane.xlu0 %44 }
  0x98   :  { %99 = vrsqrt.f32 %v49_v16  ;;  %v48_v18 = vmul.f32 0.03125, %v45_v17 }
  0x9a   :  { %v50_v19 = vadd.f32 1e-05, %v48_v18 }
  0x9c   :  { %101 = vrsqrt.f32 %v50_v19 }
  0xa5   :  { %v100_v20 = vpop.eup %99 }
  0xa6   :  { %v53_v22 = vmul.f32 %v100_v20, %v24_v6 }
  0xa8   :  { %v62_v23 = vmul.f32 %v84_v21, %v53_v22 }
  0xa9   :  { %v102_v24 = vpop.eup %101 }
  0xaa   :  { %v89_v25 = vpack.c.bf16 %v62_v23, %v62_v23  ;;  %v54_v26 = vmul.f32 %v102_v24, %v25_v7 }
  0xac   :  { %72 = vst.msk [vmem:[%s157_s4] sm:$0xf] %vm34_vm1, %v89_v25  ;;  %v63_v27 = vmul.f32 %v84_v21, %v54_v26 }
  0xae   :  { %v90_v28 = vpack.c.bf16 %v63_v27, %v63_v27 }
  0xb0   :  { %73 = vst.msk [vmem:[%s157_s4 + $0x4] sm:$0xf] %vm34_vm1, %v90_v28 }

// kernel: transformer_forward.19
= control target key start
LH: loop header
LB: loop body
LE: loop exit
PB: predicated region body
PF: predicated region fallthrough
CT: control target
= control target key end

     0   :  { %vm22_vm0 = vcmask 261120   ;;  %v342_v0 = vmov 0.0   ;;  %vm343_vm1 = vmmov 0   ;;  %vm199_vm2 = vcmask 523264   ;;  %s411_s1 = inlined_call_operand.vmem [shape: bf16[32,64], index: 1, kind: input, shape index: {}]   ;;  %s412_s0 = inlined_call_operand.vmem [shape: bf16[16,32], index: 0, kind: input, shape index: {}]   ;;  %s413_s2 = inlined_call_operand.vmem [shape: bf16[32,64], index: 2, kind: input, shape index: {}]   ;;  %s414_s3 = inlined_call_operand.vmem [shape: bf16[64,32], index: 3, kind: input, shape index: {}]   ;;  %s415_s4 = inlined_call_operand.vmem [shape: bf16[16,32], index: 4, kind: output, shape index: {}]  }
   0x1   :  { %295 = vmatprep.subr.bf16.mxu1 %v342_v0  ;;  %v325_v1 = vld [vmem:[%s411_s1 + $0x8] sm:$0xff]   ;;  %299 = vmatprep.mubr.msk.bf16.mxu1 %vm343_vm1, %v342_v0  ;;  %23 = vst.msk [vmem:[#allocation2] sm:$0xff] %vm22_vm0, %v342_v0  ;;  %24 = vst.msk [vmem:[#allocation2 + $0x8] sm:$0xff] %vm22_vm0, %v342_v0  ;;  %v326_v2 = vld [vmem:[%s411_s1] sm:$0xff]   ;;  %vm261_vm3 = vcmask 257024  }
   0x2   :  { %311 = vmatprep.subr.bf16.mxu0 %v342_v0  ;;  %319 = vmatprep.mubr.msk.bf16.mxu0 %vm343_vm1, %v342_v0  ;;  %v327_v3 = vld [vmem:[%s412_s0] sm:$0xff]   ;;  %v328_v4 = vld [vmem:[%s413_s2 + $0x8] sm:$0xff]   ;;  %v330_v6 = vld [vmem:[%s414_s3 + $0x18] sm:$0xff]  }
   0x3   :  { %296 = vmatpush3.bf16.msra.mxu1 %v325_v1  ;;  %v329_v5 = vld [vmem:[%s413_s2] sm:$0xff]   ;;  %312 = vmatpush3.bf16.msra.mxu0 %v330_v6  ;;  %v331_v7 = vld [vmem:[%s414_s3 + $0x10] sm:$0xff]   ;;  %v332_v8 = vld [vmem:[%s414_s3 + $0x8] sm:$0xff]  }
   0x4   :  { %297 = vmatprep.subr.bf16.mxu1 %v342_v0  ;;  %313 = vmatprep.subr.bf16.mxu0 %v342_v0  ;;  %v333_v9 = vld [vmem:[%s414_s3] sm:$0xff]  }
   0x7   :  { %298 = vmatpush3.bf16.msra.mxu1 %v326_v2  ;;  %314 = vmatpush3.bf16.msra.mxu0 %v331_v7 }
   0x8   :  { %303 = vmatprep.subr.bf16.mxu1 %v342_v0  ;;  %315 = vmatprep.subr.bf16.mxu0 %v342_v0  ;;  %v164_v33 = vld [vmem:[#allocation2] sm:$0xff]  ;;  %v165_v37 = vld [vmem:[#allocation2 + $0x8] sm:$0xff] }
   0xa   :  { %300 = vmatmul.mubr.msk.bf16.vlgmr.msra.gmra.mxu1 %vm22_vm0, %v327_v3 }
   0xb   :  { %304 = vmatpush3.bf16.msra.mxu1 %v328_v4  ;;  %307 = vmatprep.mubr.msk.bf16.mxu1 %vm343_vm1, %v342_v0 }
   0xc   :  { %305 = vmatprep.subr.bf16.mxu1 %v342_v0  ;;  %316 = vmatpush3.bf16.msra.mxu0 %v332_v8 }
   0xd   :  { %317 = vmatprep.subr.bf16.mxu0 %v342_v0 }
   0xf   :  { %306 = vmatpush3.bf16.msra.mxu1 %v329_v5 }
  0x10   :  { %318 = vmatpush3.bf16.msra.mxu0 %v333_v9 }
  0x12   :  { %308 = vmatmul.mubr.msk.bf16.vlgmr.msra.gmra.mxu1 %vm22_vm0, %v327_v3 }
  0xca   :  { %v86_v10 = vpop.f32.mrf.mxu1 }
  0xcb   :  { %v150_v11 = vsub.f32 0.0, %v86_v10 }
  0xcc   :  { %v301_v12 = vpop.f32.mrf.mxu1 }
  0xcd   :  { %v152_v13 = vmul.f32 1.442695, %v150_v11 }
  0xce   :  { %v89_v14 = vpop.f32.mrf.mxu1 }
  0xcf   :  { %334 = vpow2.f32 %v152_v13  ;;  %v151_v15 = vsub.f32 0.0, %v89_v14 }
  0xd0   :  { %v302_v16 = vpop.f32.mrf.mxu1 }
  0xd1   :  { %v154_v17 = vmul.f32 1.442695, %v151_v15 }
  0xd2   :  { %v143_v18 = vpop.f32.mrf.mxu1 }
  0xd3   :  { %336 = vpow2.f32 %v154_v17 }
  0xd4   :  { %v309_v19 = vpop.f32.mrf.mxu1 }
  0xd6   :  { %v146_v20 = vpop.f32.mrf.mxu1 }
  0xd8   :  { %v310_v21 = vpop.f32.mrf.mxu1 }
  0xdc   :  { %v335_v22 = vpop.eup %334 }
  0xdd   :  { %v156_v23 = vadd.f32 1.0, %v335_v22 }
  0xdf   :  { %338 = vrcp.f32 %v156_v23 }
  0xe0   :  { %v337_v24 = vpop.eup %336 }
  0xe1   :  { %v157_v25 = vadd.f32 1.0, %v337_v24 }
  0xe3   :  { %340 = vrcp.f32 %v157_v25 }
  0xec   :  { %v339_v26 = vpop.eup %338 }
  0xed   :  { %v160_v27 = vmul.f32 %v339_v26, %v86_v10 }
  0xef   :  { %v162_v30 = vmul.f32 %v160_v27, %v143_v18 }
  0xf0   :  { %v341_v28 = vpop.eup %340 }
  0xf1   :  { %v161_v29 = vmul.f32 %v341_v28, %v89_v14 }
  0xf3   :  { %v163_v31 = vmul.f32 %v161_v29, %v146_v20 }
  0xf5   :  { %v166_v32 = vpack.c.bf16 %v163_v31, %v162_v30 }
  0xf7   :  { %320 = vmatmul.mubr.msk.bf16.vlgmr.msra.gmra.mxu0 %vm199_vm2, %v166_v32 }
 0x1b7   :  { %v237_v34 = vpop.f32.mrf.mxu0 }
 0x1b8   :  { %v244_v35 = vadd.f32 %v237_v34, %v164_v33 }
 0x1b9   :  { %v321_v36 = vpop.f32.mrf.mxu0 }
 0x1ba   :  { %246 = vst.msk [vmem:[#allocation2] sm:$0xff] %vm22_vm0, %v244_v35 }
 0x1bb   :  { %v240_v38 = vpop.f32.mrf.mxu0 }
 0x1bc   :  { %v245_v39 = vadd.f32 %v240_v38, %v165_v37 }
 0x1bd   :  { %v322_v40 = vpop.f32.mrf.mxu0 }
 0x1be   :  { %247 = vst.msk [vmem:[#allocation2 + $0x8] sm:$0xff] %vm22_vm0, %v245_v39 }
 0x1c1   :  { %v251_v41 = vld [vmem:[#allocation2] sm:$0xff] }
 0x1c2   :  { %v282_v42 = vpack.c.bf16 %v251_v41, %v251_v41 }
 0x1c4   :  { %262 = vst.msk [vmem:[%s415_s4] sm:$0xf] %vm261_vm3, %v282_v42 }
 0x1c5   :  { %v252_v43 = vld [vmem:[#allocation2 + $0x8] sm:$0xff] }
 0x1c6   :  { %v283_v44 = vpack.c.bf16 %v252_v43, %v252_v43 }
 0x1c8   :  { %263 = vst.msk [vmem:[%s415_s4 + $0x4] sm:$0xf] %vm261_vm3, %v283_v44 }

// kernel: transformer_forward.26
= control target key start
LH: loop header
LB: loop body
LE: loop exit
PB: predicated region body
PF: predicated region fallthrough
CT: control target
= control target key end

     0   :  { %s191_s0 = inlined_call_operand.vmem [shape: bf16[16,32], index: 0, kind: input, shape index: {}]   ;;  %s192_s1 = inlined_call_operand.vmem [shape: bf16[16,32], index: 1, kind: input, shape index: {}]   ;;  %s193_s2 = inlined_call_operand.vmem [shape: f32[1,32], index: 2, kind: input, shape index: {}]   ;;  %s194_s3 = inlined_call_operand.hbm [shape: bf16[16,32], index: 3, kind: output, shape index: {0}]   ;;  %s195_s4 = inlined_call_operand.vmem [shape: bf16[16,32], index: 4, kind: output, shape index: {1}]  }
   0x1   :  { %v105_v0 = vld [vmem:[%s191_s0] sm:$0xff]  }
   0x2   :  { %v109_v1 = vld [vmem:[%s192_s1] sm:$0xff]   ;;  %v106_v2 = vunpack.c.l.bf16 %v105_v0  ;;  %v107_v4 = vunpack.c.h.bf16 %v105_v0 }
   0x3   :  { %v110_v3 = vunpack.c.l.bf16 %v109_v1  ;;  %v111_v5 = vunpack.c.h.bf16 %v109_v1 }
   0x4   :  { %10 = vsyncpa [#allocation3], 0  ;;  %vm40_vm0 = vcmask 261120   ;;  %vm35_vm1 = vcmask 257024   ;;  %s141_s0 = smov [#allocation2]  }
   0x5   :  { %v25_v6 = vadd.f32 %v110_v3, %v106_v2  ;;  %v26_v7 = vadd.f32 %v111_v5, %v107_v4  ;;  %s80_s19 = sshll.u32 %s141_s0, 4  ;;  %s81_s19 = int_to_ptr.vmem [resolvable:$true] %s80_s19 }
   0x6   :  { %s119_s1 = scalar_lea.vmem %s81_s19, 128  ;;  %p124_p1 = scmp.lt.s32.totalorder %s81_s19, %s81_s19 }
   0x7   :  { %v38_v8 = vmul.f32 %v25_v6, %v25_v6  ;;  %v39_v9 = vmul.f32 %v26_v7, %v26_v7  ;;  %v100_v12 = vpack.c.bf16 %v25_v6, %v25_v6  ;;  %v101_v13 = vpack.c.bf16 %v26_v7, %v26_v7  ;;  %p120_p0 = scmp.ne.s32.totalorder %s81_s19, %s119_s1  ;;  %p125_p2 = scmp.lt.s32.totalorder %s119_s1, %s119_s1 }
   0x9   :  { %v41_v10 = vsel %vm40_vm0, %v38_v8, 0.0  ;;  %v44_v11 = vsel %vm40_vm0, %v39_v9, 0.0  ;;  %36 = vst.msk [vmem:[#allocation2] sm:$0xf] %vm35_vm1, %v100_v12  ;;  %37 = vst.msk [vmem:[#allocation2 + $0x4] sm:$0xf] %vm35_vm1, %v101_v13  ;;  %p126_p3 = por %p125_p2, %p124_p1 }
   0xa   :  { %42 = vadd.xlane.f32.xlu0 %v41_v10 }
   0xb   :  { %p127_p4 = pnand %p126_p3, %p120_p0 }
   0xe   :  { %45 = vadd.xlane.f32.xlu0 %v44_v11 }
   0xf   :  { %130 = shalt.err (!%p127_p4)
}
  0x10   :  { %s142_s20 = smov 64   ;;  %s143_s21 = smov 4   ;;  %v97_v21 = vld [vmem:[%s193_s2] ss:$0 sm:$0xff] }
  0x11   :  { %86 = dma.vmem_to_hbm [thread:$0]  %s81_s19, 128, %s194_s3, [#allocation3], %s142_s20, %s142_s20, %s143_s21  }
  0x93   :  { %v43_v14 = vpop.xlane.xlu0 %42 }
  0x94   :  { %v48_v15 = vmul.f32 0.03125, %v43_v14 }
  0x96   :  { %v50_v16 = vadd.f32 1e-05, %v48_v15 }
  0x97   :  { %v46_v17 = vpop.xlane.xlu0 %45 }
  0x98   :  { %115 = vrsqrt.f32 %v50_v16  ;;  %v49_v18 = vmul.f32 0.03125, %v46_v17 }
  0x9a   :  { %v51_v19 = vadd.f32 1e-05, %v49_v18 }
  0x9c   :  { %117 = vrsqrt.f32 %v51_v19 }
  0xa5   :  { %v116_v20 = vpop.eup %115 }
  0xa6   :  { %v54_v22 = vmul.f32 %v116_v20, %v25_v6 }
  0xa8   :  { %v63_v23 = vmul.f32 %v97_v21, %v54_v22 }
  0xa9   :  { %v118_v24 = vpop.eup %117 }
  0xaa   :  { %v102_v25 = vpack.c.bf16 %v63_v23, %v63_v23  ;;  %v55_v26 = vmul.f32 %v118_v24, %v26_v7 }
  0xac   :  { %v64_v27 = vmul.f32 %v97_v21, %v55_v26  ;;  %73 = vst.msk [vmem:[%s195_s4] sm:$0xf] %vm35_vm1, %v102_v25 }
  0xae   :  { %v103_v28 = vpack.c.bf16 %v64_v27, %v64_v27 }
  0xb0   :  { %74 = vst.msk [vmem:[%s195_s4 + $0x4] sm:$0xf] %vm35_vm1, %v103_v28 }
  0xb1   :  { %139 = dma.done.wait [#allocation3], 128  }
  0xb2   :  { %140 = vsyncadd [#allocation3], 4294967168 }
  0xb3   :  { %94 = vsyncpa [#allocation3], 1 }

// kernel: transformer_forward.16
= control target key start
LH: loop header
LB: loop body
LE: loop exit
PB: predicated region body
PF: predicated region fallthrough
CT: control target
= control target key end

     0   :  { %s2280_s24 = smov 0   ;;  %s2282_s25 = smov 0   ;;  %s2528_s0 = inlined_call_operand.vmem [shape: bf16[2,4,8,8], index: 0, kind: input, shape index: {}]   ;;  %s2529_s1 = inlined_call_operand.vmem [shape: bf16[2,4,8,8], index: 1, kind: input, shape index: {}]   ;;  %s2530_s2 = inlined_call_operand.vmem [shape: bf16[2,4,8,8], index: 2, kind: input, shape index: {}]   ;;  %s2531_s3 = inlined_call_operand.vmem [shape: f32[8,8], index: 3, kind: input, shape index: {}]   ;;  %s2532_s4 = inlined_call_operand.vmem [shape: f32[8,8], index: 4, kind: input, shape index: {}]   ;;  %s2533_s5 = inlined_call_operand.vmem [shape: f32[8,8], index: 5, kind: input, shape index: {}]   ;;  %s2534_s6 = inlined_call_operand.vmem [shape: f32[8,8], index: 6, kind: input, shape index: {}]   ;;  %s2535_s7 = inlined_call_operand.vmem [shape: bf16[2,8,32], index: 7, kind: output, shape index: {}]  }
   0x1   :  { %s2284_s26 = smov 0  }
   0x2 LB: > { %s36_s27 = sadd.s32 1, %s2225_s25  ;;  %p2017_p0 = scmp.ge.s32.totalorder %s2229_s26, 1  ;;  %s2229_s26 = sphi %s2284_s26, %s17_s26   ;;  %s2225_s25 = sphi %s2282_s25, %s2537_s25   ;;  %s2221_s24 = sphi %s2280_s24, %s2536_s24  }
   0x3   : > { %p38_p1 = scmp.ge.s32.totalorder %s36_s27, 2  ;;  %p361_p2 = scmp.lt.s32.totalorder %s2229_s26, 3 }
   0x5   : > { %s2539_s27 = smov (%p38_p1, %s36_s27), 0  ;;  %p362_p3 = pnand %p2017_p0, %p361_p2 }
   0x6   : > { %p438_p4 = scmp.lt.s32.totalorder (!%p362_p3), %s2221_s24, 1  ;;  %s2232_s12 = smov (!%p362_p3), 124  }
   0x7   : > { %365 = sbr.rel (%p362_p3) target bundleno = 1058 (0x422), region = 48  ;;  %s2233_s13 = smov (!%p362_p3), 4  }
   0x8   : > { %s2238_s30 = smov (!%p362_p3), 16  }
   0xc   : > { %s2541_s24 = smov (!%p438_p4, %s2221_s24), 1  ;;  %vm515_vm0 = vcmask 64512   ;;  %v2231_v6 = vmov 0.0   ;;  %vm2234_vm1 = vmmov 0   ;;  %v2360_v25 = vld [vmem:[%s2533_s5] sm:$0xff]  ;;  %vm566_vm2 = vcmask 31744  }
   0xd   : > { %s2301_s28 = sshll.u32 %s2541_s24, 4  ;;  %2080 = vmatprep.subr.bf16.mxu0 %v2231_v6  ;;  %516 = vst.msk [vmem:[#allocation4] sm:$0xff] %vm515_vm0, %v2231_v6  ;;  %517 = vst.msk [vmem:[#allocation4 + $0x8] sm:$0xff] %vm515_vm0, %v2231_v6  ;;  %2086 = vmatprep.subr.bf16.mxu1 %v2231_v6  ;;  %v2365_v29 = vld [vmem:[%s2534_s6] sm:$0xff]  ;;  %vm587_vm3 = vcmask 60416   ;;  %vm506_vm4 = vcmask 7168  }
   0xe   : > { %s455_s8 = scalar_lea.vmem %s2529_s1, %s2301_s28  ;;  %s445_s11 = scalar_lea.vmem %s2528_s0, %s2301_s28  ;;  %518 = vst.msk [vmem:[#allocation4 + $0x10] sm:$0xff] %vm515_vm0, %v2231_v6  ;;  %519 = vst.msk [vmem:[#allocation4 + $0x18] sm:$0xff] %vm515_vm0, %v2231_v6  ;;  %2082 = vmatprep.mubr.msk.bf16.mxu0 %vm2234_vm1, %v2231_v6  ;;  %2088 = vmatprep.mubr.msk.bf16.mxu1 %vm2234_vm1, %v2231_v6  ;;  %v528_v31 = vld [vmem:[%s2531_s3] sm:$0xff]  ;;  %vm1579_vm6 = vcmask 1043456   ;;  %vm1825_vm7 = vcmask 130048   ;;  %vm1827_vm8 = vcmask 195584  }
   0xf   : > { %v2055_v0 = vld [vmem:[%s455_s8] sm:$0xff]   ;;  %v2063_v11 = vld [vmem:[%s455_s8 + $0x8] sm:$0xff]   ;;  %511 = vst.msk [vmem:[#allocation3] sm:$0xff] %vm506_vm4, %v2231_v6  ;;  %512 = vst.msk [vmem:[#allocation3 + $0x8] sm:$0xff] %vm506_vm4, %v2231_v6  ;;  %s467_s29 = scalar_lea.vmem %s2530_s2, %s2301_s28  ;;  %s2237_s28 = smov 8   ;;  %vm1830_vm9 = vcmask 257024  }
  0x10   : > { %v2047_v1 = vld [vmem:[%s445_s11] sm:$0xff]   ;;  %v2056_v2 = vunpack.c.l.bf16 %v2055_v0  ;;  %v2311_v3 = vunpack.c.h.bf16 %v2055_v0  ;;  %v2062_v12 = vld [vmem:[%s445_s11 + $0x8] sm:$0xff]   ;;  %v2333_v16 = vunpack.c.l.bf16 %v2063_v11  ;;  %v2349_v22 = vunpack.c.h.bf16 %v2063_v11  ;;  %513 = vst.msk [vmem:[#allocation3 + $0x10] sm:$0xff] %vm506_vm4, %v2231_v6  ;;  %514 = vst.msk [vmem:[#allocation3 + $0x18] sm:$0xff] %vm506_vm4, %v2231_v6  ;;  %s2239_s8 = smov 24   ;;  %s2024_s9 = sshll.u32 %s2541_s24, 2 }
  0x11   : > { %v2313_v4 = vunpack.c.l.bf16 %v2047_v1  ;;  %v2049_v5 = vunpack.c.h.bf16 %v2047_v1  ;;  %v2331_v15 = vunpack.c.l.bf16 %v2062_v12  ;;  %v2340_v19 = vunpack.c.h.bf16 %v2062_v12  ;;  %v529_v37 = vld [vmem:[%s2532_s4] sm:$0xff] }
  0x12   : > { %v1192_v7 = vsub.f32 0.0, %v2056_v2  ;;  %v1193_v13 = vsub.f32 0.0, %v2311_v3  ;;  %v1194_v20 = vsub.f32 0.0, %v2333_v16  ;;  %v1195_v24 = vsub.f32 0.0, %v2349_v22 }
  0x13   : > { %v2161_v8 = vpack.i.bf16 %v2056_v2, %v2313_v4  ;;  %v531_v9 = vsub.f32 0.0, %v2049_v5  ;;  %v2166_v10 = vpack.i.bf16 %v2311_v3, %v2049_v5  ;;  %v530_v14 = vsub.f32 0.0, %v2313_v4 }
  0x14   : > { %1200 = vrot.lane.b32.xlu1 %v1192_v7, %s2232_s12  ;;  %v2171_v17 = vpack.i.bf16 %v2333_v16, %v2331_v15  ;;  %v532_v18 = vsub.f32 0.0, %v2331_v15  ;;  %v533_v21 = vsub.f32 0.0, %v2340_v19  ;;  %v2176_v23 = vpack.i.bf16 %v2349_v22, %v2340_v19 }
  0x15   : > { %2162 = vrot.lane.b32.xlu0 %v2161_v8, %s2233_s13  ;;  %v1233_v30 = vmul.f32 %v2056_v2, %v2360_v25  ;;  %v572_v38 = vmul.f32 %v2049_v5, %v528_v31  ;;  %v571_v44 = vmul.f32 %v2313_v4, %v528_v31  ;;  %v1234_v48 = vmul.f32 %v2311_v3, %v2360_v25 }
  0x16   : > { %v573_v63 = vmul.f32 %v2331_v15, %v528_v31  ;;  %v1235_v3 = vmul.f32 %v2333_v16, %v2360_v25 }
  0x18   : > { %540 = vrot.lane.b32.xlu1 %v531_v9, %s2232_s12 }
  0x19   : > { %2167 = vrot.lane.b32.xlu0 %v2166_v10, %s2233_s13 }
  0x1c   : > { %1202 = vrot.lane.b32.xlu1 %v1193_v13, %s2232_s12 }
  0x1d   : > { %538 = vrot.lane.b32.xlu0 %v530_v14, %s2232_s12 }
  0x20   : > { %2172 = vrot.lane.b32.xlu1 %v2171_v17, %s2233_s13 }
  0x21   : > { %542 = vrot.lane.b32.xlu0 %v532_v18, %s2232_s12  ;;  %v574_v18 = vmul.f32 %v2340_v19, %v528_v31 }
  0x24   : > { %544 = vrot.lane.b32.xlu1 %v533_v21, %s2232_s12 }
  0x25   : > { %1204 = vrot.lane.b32.xlu0 %v1194_v20, %s2232_s12  ;;  %v1236_v20 = vmul.f32 %v2349_v22, %v2360_v25 }
  0x28   : > { %1206 = vrot.lane.b32.xlu1 %v1195_v24, %s2232_s12  ;;  %s500_s12 = scalar_lea.vmem %s2535_s7, %s2024_s9 }
  0x29   : > { %2177 = vrot.lane.b32.xlu0 %v2176_v23, %s2233_s13 }
  0x86   : > { %v1201_v26 = vpop.permute.xlu1 %1200 }
  0x87   : > { %v2163_v27 = vpop.permute.xlu0 %2162 }
  0x88   : > { %v2165_v28 = vunpack.i.h.bf16 %v2163_v27  ;;  %v2164_v40 = vunpack.i.l.bf16 %v2163_v27 }
  0x8a   : > { %v1229_v32 = vsel %vm566_vm2, %v1201_v26, %v2165_v28  ;;  %v541_v33 = vpop.permute.xlu1 %540 }
  0x8b   : > { %v2168_v34 = vpop.permute.xlu0 %2167  ;;  %v1237_v35 = vmul.f32 %v1229_v32, %v2365_v29 }
  0x8c   : > { %v2169_v36 = vunpack.i.l.bf16 %v2168_v34  ;;  %v2170_v41 = vunpack.i.h.bf16 %v2168_v34  ;;  %v2235_v34 = vmov -inf  }
  0x8d   : > { %v1241_v39 = vadd.f32 %v1237_v35, %v1233_v30  ;;  %508 = vst.msk [vmem:[#allocation2 + $0x8] sm:$0xff] %vm506_vm4, %v2235_v34  ;;  %507 = vst.msk [vmem:[#allocation2] sm:$0xff] %vm506_vm4, %v2235_v34  ;;  %v1442_v35 = vlaneseq }
  0x8e   : > { %v568_v42 = vsel %vm566_vm2, %v541_v33, %v2169_v36  ;;  %v1203_v43 = vpop.permute.xlu1 %1202  ;;  %509 = vst.msk [vmem:[#allocation2 + $0x10] sm:$0xff] %vm506_vm4, %v2235_v34  ;;  %510 = vst.msk [vmem:[#allocation2 + $0x18] sm:$0xff] %vm506_vm4, %v2235_v34 }
  0x8f   : > { %v576_v45 = vmul.f32 %v568_v42, %v529_v37  ;;  %v539_v46 = vpop.permute.xlu0 %538  ;;  %v1245_v47 = vpack.c.bf16 %v1241_v39, %v1241_v39  ;;  %v1230_v49 = vsel %vm566_vm2, %v1203_v43, %v2170_v41  ;;  %v1443_v36 = vshrl.u32 %v1442_v35, 7 }
  0x90   : > { %v567_v50 = vsel %vm566_vm2, %v539_v46, %v2164_v40  ;;  %v1238_v51 = vmul.f32 %v1230_v49, %v2365_v29 }
  0x91   : > { %v580_v52 = vadd.f32 %v576_v45, %v572_v38  ;;  %v575_v53 = vmul.f32 %v567_v50, %v529_v37  ;;  %v1262_v54 = vsel %vm515_vm0, %v1245_v47, 0 }
  0x92   : > { %2081 = vmatpush3.bf16.xpose.msra.mxu0 %v1262_v54  ;;  %v2173_v57 = vpop.permute.xlu1 %2172  ;;  %v1242_v59 = vadd.f32 %v1238_v51, %v1234_v48 }
  0x93   : > { %v584_v55 = vpack.c.bf16 %v580_v52, %v580_v52  ;;  %v579_v56 = vadd.f32 %v575_v53, %v571_v44  ;;  %v543_v58 = vpop.permute.xlu0 %542  ;;  %2092 = vmatprep.subr.bf16.mxu0 %v2231_v6  ;;  %v2175_v60 = vunpack.i.h.bf16 %v2173_v57  ;;  %v2174_v61 = vunpack.i.l.bf16 %v2173_v57 }
  0x94   : > { %v1246_v0 = vpack.c.bf16 %v1242_v59, %v1242_v59 }
  0x95   : > { %589 = vst.msk [vmem:[#allocation5 + $0x4] sm:$0xf] %vm587_vm3, %v584_v55  ;;  %v583_v62 = vpack.c.bf16 %v579_v56, %v579_v56  ;;  %v569_v1 = vsel %vm566_vm2, %v543_v58, %v2174_v61  ;;  %v2236_v58 = vmov 0  }
  0x96   : > { %v577_v2 = vmul.f32 %v569_v1, %v529_v37  ;;  %v1308_v5 = vsel %vm515_vm0, %v1246_v0, 0  ;;  %v545_v7 = vpop.permute.xlu1 %544  ;;  %2182 = vset.pattern.permute.xlu0 %v2236_v58  ;;  %2181 = vset.pattern.permute.xlu1 %v2236_v58  ;;  %v2450_v0 = vld [vmem:[#allocation2] sm:$0xff] }
  0x97   : > { %588 = vst.msk [vmem:[#allocation5] sm:$0xf] %vm587_vm3, %v583_v62  ;;  %v1205_v4 = vpop.permute.xlu0 %1204  ;;  %2087 = vmatpush3.bf16.xpose.msra.mxu1 %v1308_v5 }
  0x98   : > { %v1231_v8 = vsel %vm566_vm2, %v1205_v4, %v2175_v60  ;;  %v581_v9 = vadd.f32 %v577_v2, %v573_v63  ;;  %2098 = vmatprep.subr.bf16.mxu1 %v2231_v6  ;;  %v2448_v63 = vld [vmem:[#allocation2 + $0x8] sm:$0xff] }
  0x99   : > { %v1239_v10 = vmul.f32 %v1231_v8, %v2365_v29  ;;  %v1453_v8 = vld [vmem:[#allocation2 + $0x10] sm:$0xff] }
  0x9a   : > { %v585_v11 = vpack.c.bf16 %v581_v9, %v581_v9  ;;  %v1207_v14 = vpop.permute.xlu1 %1206 }
  0x9b   : > { %v1243_v12 = vadd.f32 %v1239_v10, %v1235_v3  ;;  %v2178_v13 = vpop.permute.xlu0 %2177 }
  0x9c   : > { %v2180_v15 = vunpack.i.h.bf16 %v2178_v13  ;;  %v2179_v17 = vunpack.i.l.bf16 %v2178_v13  ;;  %590 = vst.msk [vmem:[#allocation5 + $0x8] sm:$0xf] %vm587_vm3, %v585_v11  ;;  %v1254_v26 = vld [vmem:[#allocation5 + $0x4] sm:$0xf] }
  0x9d   : > { %v1247_v16 = vpack.c.bf16 %v1243_v12, %v1243_v12  ;;  %v2469_v12 = vld [vmem:[#allocation2 + $0x18] sm:$0xff] }
  0x9e   : > { %v570_v21 = vsel %vm566_vm2, %v545_v7, %v2179_v17  ;;  %v1232_v23 = vsel %vm566_vm2, %v1207_v14, %v2180_v15  ;;  %v1253_v24 = vld [vmem:[#allocation5] sm:$0xf]  ;;  %2089 = vmatmul.mubr.msk.bf16.vlgmr.msra.gmra.mxu1 %vm515_vm0, %v1254_v26  ;;  %v1250_v17 = vld [vmem:[%s467_s29 + $0x4] sm:$0xf] }
  0x9f   : > { %v578_v27 = vmul.f32 %v570_v21, %v529_v37  ;;  %v1240_v28 = vmul.f32 %v1232_v23, %v2365_v29  ;;  %2083 = vmatmul.mubr.msk.bf16.vlgmr.msra.gmra.mxu0 %vm515_vm0, %v1253_v24  ;;  %v1354_v30 = vsel %vm515_vm0, %v1247_v16, 0  ;;  %2100 = vmatprep.mubr.msk.bf16.mxu1 %vm2234_vm1, %v2231_v6  ;;  %v1445_v37 = vand.u32 127, %v1442_v35  ;;  %v1249_v15 = vld [vmem:[%s467_s29] sm:$0xf]  ;;  %v1251_v21 = vld [vmem:[%s467_s29 + $0x8] sm:$0xf] }
  0xa0   : > { %2093 = vmatpush3.bf16.xpose.msra.mxu0 %v1354_v30  ;;  %2094 = vmatprep.mubr.msk.bf16.mxu0 %vm2234_vm1, %v2231_v6  ;;  %v1581_v16 = vsel %vm1579_vm6, %v1249_v15, 0  ;;  %v1673_v23 = vsel %vm1579_vm6, %v1251_v21, 0  ;;  %v1252_v24 = vld [vmem:[%s467_s29 + $0xc] sm:$0xf] }
  0xa1   : > { %v582_v19 = vadd.f32 %v578_v27, %v574_v18  ;;  %v1244_v22 = vadd.f32 %v1240_v28, %v1236_v20  ;;  %2104 = vmatprep.subr.bf16.mxu0 %v2231_v6  ;;  %vm1446_vm5 = vcmp.le.s32.totalorder %v1445_v37, %v1443_v36  ;;  %v1627_v18 = vsel %vm1579_vm6, %v1250_v17, 0 }
  0xa2   : > { %v1719_v26 = vsel %vm1579_vm6, %v1252_v24, 0 }
  0xa3   : > { %v586_v25 = vpack.c.bf16 %v582_v19, %v582_v19  ;;  %v1248_v31 = vpack.c.bf16 %v1244_v22, %v1244_v22  ;;  %v1255_v32 = vld [vmem:[#allocation5 + $0x8] sm:$0xf] }
  0xa5   : > { %591 = vst.msk [vmem:[#allocation5 + $0xc] sm:$0xf] %vm587_vm3, %v586_v25  ;;  %v1400_v29 = vsel %vm515_vm0, %v1248_v31, 0 }
  0xa6   : > { %2099 = vmatpush3.bf16.xpose.msra.mxu1 %v1400_v29 }
  0xa7   : > { %2095 = vmatmul.mubr.msk.bf16.vlgmr.msra.gmra.mxu0 %vm515_vm0, %v1255_v32  ;;  %2110 = vmatprep.subr.bf16.mxu1 %v2231_v6 }
  0xa8   : > { %2106 = vmatprep.mubr.msk.bf16.mxu0 %vm2234_vm1, %v2231_v6  ;;  %2105 = vmatpush3.bf16.msra.mxu0 %v1581_v16  ;;  %v1544_v16 = vld [vmem:[#allocation4] sm:$0xff] }
  0xa9   : > { %2116 = vmatprep.subr.bf16.mxu0 %v2231_v6 }
  0xac   : > { %v1256_v33 = vld [vmem:[#allocation5 + $0xc] sm:$0xf] }
  0xad   : > { %2101 = vmatmul.mubr.msk.bf16.vlgmr.msra.gmra.mxu1 %vm515_vm0, %v1256_v33 }
  0xae   : > { %2112 = vmatprep.mubr.msk.bf16.mxu1 %vm2234_vm1, %v2231_v6  ;;  %2111 = vmatpush3.bf16.msra.mxu1 %v1627_v18 }
  0xaf   : > { %2122 = vmatprep.subr.bf16.mxu1 %v2231_v6 }
 0x15e   : > { %v1344_v39 = vpop.f32.mrf.mxu1 }
 0x15f   : > { %v1298_v38 = vpop.f32.mrf.mxu0  ;;  %v2435_v41 = vsel %vm1446_vm5, %v1344_v39, -inf }
 0x160   : > { %v2432_v40 = vsel %vm1446_vm5, %v1298_v38, -inf  ;;  %v2090_v43 = vpop.f32.mrf.mxu1  ;;  %v1458_v44 = vsel %vm515_vm0, %v2435_v41, -inf }
 0x161   : > { %v2084_v42 = vpop.f32.mrf.mxu0  ;;  %v1455_v45 = vsel %vm515_vm0, %v2432_v40, -inf  ;;  %1459 = vmax.xlane.f32.xlu1 %v1458_v44 }
 0x162   : > { %1456 = vmax.xlane.f32.xlu0 %v1455_v45  ;;  %v1347_v47 = vpop.f32.mrf.mxu1 }
 0x163   : > { %v1301_v46 = vpop.f32.mrf.mxu0 }
 0x164   : > { %v2091_v49 = vpop.f32.mrf.mxu1 }
 0x165   : > { %v2085_v48 = vpop.f32.mrf.mxu0 }
 0x167   : > { %v1390_v50 = vpop.f32.mrf.mxu0 }
 0x168   : > { %v2442_v51 = vsel %vm1446_vm5, %v1390_v50, -inf }
 0x169   : > { %v2096_v52 = vpop.f32.mrf.mxu0  ;;  %v1461_v53 = vsel %vm515_vm0, %v2442_v51, -inf }
 0x16a   : > { %1462 = vmax.xlane.f32.xlu0 %v1461_v53 }
 0x16b   : > { %v1393_v54 = vpop.f32.mrf.mxu0 }
 0x16d   : > { %v2097_v55 = vpop.f32.mrf.mxu0  ;;  %v1436_v56 = vpop.f32.mrf.mxu1 }
 0x16e   : > { %v1450_v57 = vsel %vm1446_vm5, %v1436_v56, -inf  ;;  %v1516_v55 = vld [vmem:[#allocation3 + $0x8] sm:$0xff] }
 0x16f   : > { %v2102_v59 = vpop.f32.mrf.mxu1  ;;  %v1464_v60 = vsel %vm515_vm0, %v1450_v57, -inf }
 0x170   : > { %1465 = vmax.xlane.f32.xlu0 %v1464_v60  ;;  %v1517_v59 = vld [vmem:[#allocation3 + $0x10] sm:$0xff] }
 0x171   : > { %v1439_v61 = vpop.f32.mrf.mxu1 }
 0x173   : > { %v2103_v62 = vpop.f32.mrf.mxu1 }
 0x1ea   : > { %v1460_v1 = vpop.xlane.xlu1 %1459 }
 0x1eb   : > { %v1457_v2 = vpop.xlane.xlu0 %1456  ;;  %v2453_v3 = vmax.f32 %v2448_v63, %v1460_v1 }
 0x1ec   : > { %v2456_v4 = vmax.f32 %v2450_v0, %v1457_v2 }
 0x1ed   : > { %v1472_v5 = vsub.f32 %v2448_v63, %v2453_v3  ;;  %1770 = vst.msk [vmem:[#allocation2 + $0x8] sm:$0xff] %vm506_vm4, %v2453_v3  ;;  %1490 = vperm.xlu0 %2182, %v2453_v3   ;;  %v1518_v63 = vld [vmem:[#allocation3 + $0x18] sm:$0xff]  ;;  %v1515_v3 = vld [vmem:[#allocation3] sm:$0xff] }
 0x1ee   : > { %v1471_v7 = vsub.f32 %v2450_v0, %v2456_v4  ;;  %1769 = vst.msk [vmem:[#allocation2] sm:$0xff] %vm506_vm4, %v2456_v4  ;;  %1485 = vperm.xlu1 %2181, %v2456_v4  }
 0x1f0   : > { %v1475_v48 = vmul.f32 1.442695, %v1471_v7 }
 0x1f3   : > { %v1463_v9 = vpop.xlane.xlu0 %1462 }
 0x1f4   : > { %v1469_v10 = vmax.f32 %v1453_v8, %v1463_v9 }
 0x1f6   : > { %v1473_v11 = vsub.f32 %v1453_v8, %v1469_v10  ;;  %1771 = vst.msk [vmem:[#allocation2 + $0x10] sm:$0xff] %vm506_vm4, %v1469_v10  ;;  %1495 = vperm.xlu1 %2181, %v1469_v10  }
 0x1f8   : > { %v1479_v45 = vmul.f32 1.442695, %v1473_v11 }
 0x1f9   : > { %v1466_v13 = vpop.xlane.xlu0 %1465 }
 0x1fa   : > { %v2476_v14 = vmax.f32 %v2469_v12, %v1466_v13 }
 0x1fc   : > { %v1474_v20 = vsub.f32 %v2469_v12, %v2476_v14  ;;  %1772 = vst.msk [vmem:[#allocation2 + $0x18] sm:$0xff] %vm506_vm4, %v2476_v14  ;;  %1500 = vperm.xlu1 %2181, %v2476_v14  }
 0x1fe   : > { %v1481_v50 = vmul.f32 1.442695, %v1474_v20  ;;  %v1545_v20 = vld [vmem:[#allocation4 + $0x8] sm:$0xff] }
 0x268   : > { %v1491_v28 = vpop.permute.xlu0 %1490 }
 0x269   : > { %v1486_v27 = vpop.permute.xlu1 %1485  ;;  %v1504_v19 = vsub.f32 %v2435_v41, %v1491_v28 }
 0x26a   : > { %v1503_v30 = vsub.f32 %v2432_v40, %v1486_v27 }
 0x26b   : > { %v1509_v25 = vmul.f32 1.442695, %v1504_v19 }
 0x26c   : > { %v1507_v22 = vmul.f32 1.442695, %v1503_v30 }
 0x26e   : > { %2183 = vpow2.f32 %v1507_v22 }
 0x26f   : > { %2185 = vpow2.f32 %v1509_v25  ;;  %v1546_v25 = vld [vmem:[#allocation4 + $0x10] sm:$0xff] }
 0x271   : > { %v1496_v31 = vpop.permute.xlu1 %1495 }
 0x272   : > { %v1505_v29 = vsub.f32 %v2442_v51, %v1496_v31 }
 0x274   : > { %v1511_v32 = vmul.f32 1.442695, %v1505_v29 }
 0x276   : > { %2187 = vpow2.f32 %v1511_v32 }
 0x277   : > { %v1501_v33 = vpop.permute.xlu1 %1500 }
 0x278   : > { %v1506_v34 = vsub.f32 %v1450_v57, %v1501_v33 }
 0x27a   : > { %v1513_v35 = vmul.f32 1.442695, %v1506_v34 }
 0x27b   : > { %v2184_v36 = vpop.eup %2183 }
 0x27c   : > { %v2186_v37 = vpop.eup %2185  ;;  %2189 = vpow2.f32 %v1513_v35  ;;  %v1572_v38 = vpack.c.bf16 %v2184_v36, %v2184_v36  ;;  %v1523_v49 = vsel %vm515_vm0, %v2184_v36, 0.0 }
 0x27d   : > { %v1526_v39 = vsel %vm515_vm0, %v2186_v37, 0.0  ;;  %v1573_v40 = vpack.c.bf16 %v2186_v37, %v2186_v37  ;;  %2191 = vpow2.f32 %v1479_v45  ;;  %v1547_v37 = vld [vmem:[#allocation4 + $0x18] sm:$0xff] }
 0x27e   : > { %1527 = vadd.xlane.f32.xlu1 %v1526_v39  ;;  %2107 = vmatmul.mubr.msk.bf16.vlgmr.msra.gmra.mxu0 %vm515_vm0, %v1572_v38  ;;  %2193 = vpow2.f32 %v1475_v48 }
 0x27f   : > { %2113 = vmatmul.mubr.msk.bf16.vlgmr.msra.gmra.mxu1 %vm515_vm0, %v1573_v40  ;;  %2117 = vmatpush3.bf16.msra.mxu0 %v1673_v23 }
 0x280   : > { %2118 = vmatprep.mubr.msk.bf16.mxu0 %vm2234_vm1, %v2231_v6  ;;  %2123 = vmatpush3.bf16.msra.mxu1 %v1719_v26 }
 0x281   : > { %2124 = vmatprep.mubr.msk.bf16.mxu1 %vm2234_vm1, %v2231_v6  ;;  %v1477_v6 = vmul.f32 1.442695, %v1472_v5 }
 0x283   : > { %v2188_v41 = vpop.eup %2187  ;;  %2195 = vpow2.f32 %v1477_v6 }
 0x284   : > { %v1529_v42 = vsel %vm515_vm0, %v2188_v41, 0.0  ;;  %v1574_v43 = vpack.c.bf16 %v2188_v41, %v2188_v41  ;;  %2197 = vpow2.f32 %v1481_v50 }
 0x285   : > { %1530 = vadd.xlane.f32.xlu0 %v1529_v42 }
 0x286   : > { %2119 = vmatmul.mubr.msk.bf16.vlgmr.msra.gmra.mxu0 %vm515_vm0, %v1574_v43 }
 0x289   : > { %v2190_v44 = vpop.eup %2189 }
 0x28a   : > { %v1532_v46 = vsel %vm515_vm0, %v2190_v44, 0.0  ;;  %v1575_v47 = vpack.c.bf16 %v2190_v44, %v2190_v44  ;;  %v2192_v51 = vpop.eup %2191 }
 0x28b   : > { %1533 = vadd.xlane.f32.xlu1 %v1532_v46  ;;  %v2194_v52 = vpop.eup %2193  ;;  %v1521_v60 = vmul.f32 %v2192_v51, %v1517_v59 }
 0x28c   : > { %2125 = vmatmul.mubr.msk.bf16.vlgmr.msra.gmra.mxu1 %vm515_vm0, %v1575_v47  ;;  %v1519_v5 = vmul.f32 %v2194_v52, %v1515_v3 }
 0x28f   : > { %1524 = vadd.xlane.f32.xlu1 %v1523_v49 }
 0x290   : > { %v2196_v53 = vpop.eup %2195 }
 0x291   : > { %v2198_v54 = vpop.eup %2197  ;;  %v1520_v56 = vmul.f32 %v2196_v53, %v1516_v55 }
 0x292   : > { %v1522_v1 = vmul.f32 %v2198_v54, %v1518_v63 }
 0x29b   : > { %1560 = vperm.xlu0 %2182, %v2192_v51  }
 0x29f   : > { %1550 = vperm.xlu0 %2182, %v2194_v52  }
 0x2a0   : > { %1555 = vperm.xlu1 %2181, %v2196_v53  }
 0x2a4   : > { %1565 = vperm.xlu1 %2181, %v2198_v54  }
 0x307   : > { %v1528_v57 = vpop.xlane.xlu1 %1527 }
 0x308   : > { %v1536_v58 = vadd.f32 %v1528_v57, %v1520_v56 }
 0x30a   : > { %1541 = vst.msk [vmem:[#allocation3 + $0x8] sm:$0xff] %vm506_vm4, %v1536_v58 }
 0x30e   : > { %v1531_v61 = vpop.xlane.xlu0 %1530 }
 0x30f   : > { %v1537_v62 = vadd.f32 %v1531_v61, %v1521_v60 }
 0x311   : > { %1542 = vst.msk [vmem:[#allocation3 + $0x10] sm:$0xff] %vm506_vm4, %v1537_v62  ;;  %v1774_v0 = vld [vmem:[#allocation3 + $0x8] sm:$0xff] }
 0x312   : > { %2199 = vrcp.f32 %v1774_v0 }
 0x314   : > { %v1534_v2 = vpop.xlane.xlu1 %1533 }
 0x315   : > { %v1538_v4 = vadd.f32 %v1534_v2, %v1522_v1 }
 0x316   : > { %v1561_v17 = vpop.permute.xlu0 %1560 }
 0x317   : > { %1543 = vst.msk [vmem:[#allocation3 + $0x18] sm:$0xff] %vm506_vm4, %v1538_v4  ;;  %v1570_v33 = vmul.f32 %v1561_v17, %v1546_v25 }
 0x318   : > { %v1525_v7 = vpop.xlane.xlu1 %1524  ;;  %v1775_v8 = vld [vmem:[#allocation3 + $0x10] sm:$0xff] }
 0x319   : > { %v1535_v9 = vadd.f32 %v1525_v7, %v1519_v5  ;;  %2201 = vrcp.f32 %v1775_v8 }
 0x31a   : > { %v1551_v18 = vpop.permute.xlu0 %1550 }
 0x31b   : > { %1540 = vst.msk [vmem:[#allocation3] sm:$0xff] %vm506_vm4, %v1535_v9  ;;  %v1568_v23 = vmul.f32 %v1551_v18, %v1544_v16 }
 0x31c   : > { %v1556_v21 = vpop.permute.xlu1 %1555 }
 0x31d   : > { %v1569_v24 = vmul.f32 %v1556_v21, %v1545_v20 }
 0x31e   : > { %v1776_v10 = vld [vmem:[#allocation3 + $0x18] sm:$0xff] }
 0x31f   : > { %v2200_v11 = vpop.eup %2199  ;;  %2203 = vrcp.f32 %v1776_v10 }
 0x320   : > { %1792 = vperm.xlu1 %2181, %v2200_v11   ;;  %v1566_v38 = vpop.permute.xlu1 %1565 }
 0x321   : > { %v1571_v41 = vmul.f32 %v1566_v38, %v1547_v37 }
 0x322   : > { %v1773_v12 = vld [vmem:[#allocation3] sm:$0xff] }
 0x323   : > { %2205 = vrcp.f32 %v1773_v12 }
 0x326   : > { %v2202_v13 = vpop.eup %2201 }
 0x327   : > { %1800 = vperm.xlu1 %2181, %v2202_v13  }
 0x32c   : > { %v2204_v14 = vpop.eup %2203 }
 0x32d   : > { %1808 = vperm.xlu1 %2181, %v2204_v14  }
 0x330   : > { %v2206_v15 = vpop.eup %2205 }
 0x331   : > { %1784 = vperm.xlu1 %2181, %v2206_v15  }
 0x33e   : > { %v1617_v26 = vpop.f32.mrf.mxu0 }
 0x33f   : > { %v1761_v27 = vadd.f32 %v1617_v26, %v1568_v23  ;;  %v1663_v28 = vpop.f32.mrf.mxu1 }
 0x340   : > { %v1762_v30 = vadd.f32 %v1663_v28, %v1569_v24  ;;  %v2108_v19 = vpop.f32.mrf.mxu0 }
 0x341   : > { %1765 = vst.msk [vmem:[#allocation4] sm:$0xff] %vm515_vm0, %v1761_v27  ;;  %v2114_v22 = vpop.f32.mrf.mxu1 }
 0x342   : > { %1766 = vst.msk [vmem:[#allocation4 + $0x8] sm:$0xff] %vm515_vm0, %v1762_v30  ;;  %v1620_v31 = vpop.f32.mrf.mxu0 }
 0x343   : > { %v1666_v29 = vpop.f32.mrf.mxu1 }
 0x344   : > { %v2109_v32 = vpop.f32.mrf.mxu0 }
 0x345   : > { %v2115_v34 = vpop.f32.mrf.mxu1 }
 0x346   : > { %v1709_v35 = vpop.f32.mrf.mxu0 }
 0x347   : > { %v1763_v36 = vadd.f32 %v1709_v35, %v1570_v33 }
 0x348   : > { %v2120_v39 = vpop.f32.mrf.mxu0  ;;  %v1781_v57 = vld [vmem:[#allocation4] sm:$0xff] }
 0x349   : > { %1767 = vst.msk [vmem:[#allocation4 + $0x10] sm:$0xff] %vm515_vm0, %v1763_v36  ;;  %v1789_v6 = vld [vmem:[#allocation4 + $0x8] sm:$0xff] }
 0x34a   : > { %v1712_v40 = vpop.f32.mrf.mxu0 }
 0x34c   : > { %v2121_v42 = vpop.f32.mrf.mxu0  ;;  %v1755_v43 = vpop.f32.mrf.mxu1 }
 0x34d   : > { %v1764_v44 = vadd.f32 %v1755_v43, %v1571_v41 }
 0x34e   : > { %v2126_v45 = vpop.f32.mrf.mxu1 }
 0x34f   : > { %1768 = vst.msk [vmem:[#allocation4 + $0x18] sm:$0xff] %vm515_vm0, %v1764_v44 }
 0x350   : > { %v1758_v46 = vpop.f32.mrf.mxu1  ;;  %v1797_v51 = vld [vmem:[#allocation4 + $0x10] sm:$0xff] }
 0x352   : > { %v2127_v47 = vpop.f32.mrf.mxu1 }
 0x356   : > { %v1805_v54 = vld [vmem:[#allocation4 + $0x18] sm:$0xff] }
 0x39b   : > { %v1793_v48 = vpop.permute.xlu1 %1792 }
 0x39c   : > { %v1795_v49 = vmul.f32 %v1793_v48, %v1789_v6 }
 0x39e   : > { %1813 = vrot.lane.b32.xlu0 %v1795_v49, %s2237_s28 }
 0x3a2   : > { %v1801_v50 = vpop.permute.xlu1 %1800 }
 0x3a3   : > { %v1803_v52 = vmul.f32 %v1801_v50, %v1797_v51 }
 0x3a5   : > { %1817 = vrot.lane.b32.xlu1 %v1803_v52, %s2238_s30 }
 0x3a8   : > { %v1809_v53 = vpop.permute.xlu1 %1808 }
 0x3a9   : > { %v1811_v55 = vmul.f32 %v1809_v53, %v1805_v54 }
 0x3ab   : > { %1821 = vrot.lane.b32.xlu0 %v1811_v55, %s2239_s8 }
 0x3ac   : > { %v1785_v56 = vpop.permute.xlu1 %1784 }
 0x3ad   : > { %v1787_v59 = vmul.f32 %v1785_v56, %v1781_v57 }
 0x410   : > { %v1814_v58 = vpop.permute.xlu0 %1813 }
 0x411   : > { %v1824_v61 = vsel %vm515_vm0, %v1787_v59, %v1814_v58 }
 0x417   : > { %v1818_v60 = vpop.permute.xlu1 %1817 }
 0x418   : > { %v1826_v62 = vsel %vm1825_vm7, %v1824_v61, %v1818_v60 }
 0x41d   : > { %v1822_v63 = vpop.permute.xlu0 %1821 }
 0x41e   : > { %v1828_v0 = vsel %vm1827_vm8, %v1826_v62, %v1822_v63 }
 0x41f   : > { %v1829_v1 = vpack.c.bf16 %v1828_v0, %v1828_v0 }
 0x421   : > { %1831 = vst.msk [vmem:[%s500_s12] sm:$0xf] %vm1830_vm9, %v1829_v1 }
 0x422 PF: > { %s17_s26 = sadd.s32 1, %s2229_s26   ;;  %s2536_s24 = smov %s2225_s25 }
 0x423   : > { %p14_p5 = scmp.ge.s32.totalorder %s17_s26, 4   ;;  %s2537_s25 = smov %s2539_s27 }
 0x425   :  { %16 = sbr.rel (!%p14_p5) target bundleno = 2 (0x2), region = 111 }

// kernel: transformer_forward.27
= control target key start
LH: loop header
LB: loop body
LE: loop exit
PB: predicated region body
PF: predicated region fallthrough
CT: control target
= control target key end

     0   :  { %v162_v1 = vmov 0.0   ;;  %vm163_vm0 = vmmov 0   ;;  %vm17_vm1 = vcmask 261120   ;;  %s201_s0 = inlined_call_operand.vmem [shape: bf16[16,32], index: 0, kind: input, shape index: {}]   ;;  %s202_s1 = inlined_call_operand.vmem [shape: bf16[32,32], index: 1, kind: input, shape index: {}]   ;;  %s203_s2 = inlined_call_operand.hbm [shape: f32[16,32], index: 2, kind: output, shape index: {}]  }
   0x1   :  { %v137_v0 = vld [vmem:[%s202_s1 + $0x8] sm:$0xff]   ;;  %124 = vmatprep.subr.bf16.mxu0 %v162_v1  ;;  %v138_v2 = vld [vmem:[%s202_s1] sm:$0xff]   ;;  %128 = vmatprep.mubr.msk.bf16.mxu0 %vm163_vm0, %v162_v1  ;;  %18 = vst.msk [vmem:[#allocation2] sm:$0xff] %vm17_vm1, %v162_v1  ;;  %19 = vst.msk [vmem:[#allocation2 + $0x8] sm:$0xff] %vm17_vm1, %v162_v1 }
   0x2   :  { %125 = vmatpush3.bf16.msra.mxu0 %v137_v0 }
   0x3   :  { %126 = vmatprep.subr.bf16.mxu0 %v162_v1 }
   0x4   :  { %7 = vsyncpa [#allocation4], 0  ;;  %v139_v3 = vld [vmem:[%s201_s0] sm:$0xff]   ;;  %s164_s1 = smov [#allocation3]  }
   0x5   :  { %s106_s15 = sshll.u32 %s164_s1, 4  ;;  %s107_s15 = int_to_ptr.vmem [resolvable:$true] %s106_s15 }
   0x6   :  { %127 = vmatpush3.bf16.msra.mxu0 %v138_v2  ;;  %s140_s0 = scalar_lea.vmem %s107_s15, 256  ;;  %p145_p1 = scmp.lt.s32.totalorder %s107_s15, %s107_s15 }
   0x7   :  { %p141_p0 = scmp.ne.s32.totalorder %s107_s15, %s140_s0  ;;  %p146_p2 = scmp.lt.s32.totalorder %s140_s0, %s140_s0 }
   0x8   :  { %v20_v4 = vld [vmem:[#allocation2] sm:$0xff]  ;;  %v21_v8 = vld [vmem:[#allocation2 + $0x8] sm:$0xff] }
   0x9   :  { %129 = vmatmul.mubr.msk.bf16.vlgmr.msra.gmra.mxu0 %vm17_vm1, %v139_v3  ;;  %p147_p3 = por %p146_p2, %p145_p1 }
   0xb   :  { %p148_p4 = pnand %p147_p3, %p141_p0 }
  0xc9   :  { %v83_v5 = vpop.f32.mrf.mxu0 }
  0xca   :  { %v90_v6 = vadd.f32 %v83_v5, %v20_v4 }
  0xcb   :  { %v130_v7 = vpop.f32.mrf.mxu0 }
  0xcc   :  { %92 = vst.msk [vmem:[#allocation2] sm:$0xff] %vm17_vm1, %v90_v6 }
  0xcd   :  { %v86_v9 = vpop.f32.mrf.mxu0 }
  0xce   :  { %v91_v10 = vadd.f32 %v86_v9, %v21_v8 }
  0xcf   :  { %v131_v11 = vpop.f32.mrf.mxu0 }
  0xd0   :  { %93 = vst.msk [vmem:[#allocation2 + $0x8] sm:$0xff] %vm17_vm1, %v91_v10 }
  0xd3   :  { %v97_v12 = vld [vmem:[#allocation2] sm:$0xff] }
  0xd4   :  { %99 = vst.msk [vmem:[#allocation3] sm:$0xff] %vm17_vm1, %v97_v12 }
  0xd7   :  { %v98_v13 = vld [vmem:[#allocation2 + $0x8] sm:$0xff] }
  0xd8   :  { %100 = vst.msk [vmem:[#allocation3 + $0x8] sm:$0xff] %vm17_vm1, %v98_v13 }
  0xd9   :  { %151 = shalt.err (!%p148_p4)
}
  0xda   :  { %s165_s16 = smov 128   ;;  %s166_s17 = smov 8  }
  0xdb   :  { %112 = dma.vmem_to_hbm [thread:$0]  %s107_s15, 256, %s203_s2, [#allocation4], %s165_s16, %s165_s16, %s166_s17  }
  0xdc   :  { %160 = dma.done.wait [#allocation4], 256  }
  0xdd   :  { %161 = vsyncadd [#allocation4], 4294967040 }
  0xde   :  { %116 = vsyncpa [#allocation4], 1 }

</bundles_post_ra>
